<compile_context>
chip_gen: v6e
topology: v6e:2x2x1
jax: 0.10.0
libtpu: 0.0.40
codegen_flags: <defaults>
</compile_context>

<pallas_src>
import jax
import jax.numpy as jnp
import numpy as np
from jax.experimental import pallas as pl
from jax.experimental.pallas import tpu as pltpu

EPS = 1e-5  # GroupNorm default eps


def _make_kernel(C_in, C_conv, T, B_blk, K, dilation, pad_left):
    Ttot = B_blk * T
    inv_n = 1.0 / float(C_conv * T)   # element count of one sample's (C, T) slab

    def cln(y, seg, segT, g, bt):
        # Single-pass per-sample stats (sum, sum of squares) via segment matmuls.
        s1 = jnp.sum(jnp.dot(y, seg, preferred_element_type=jnp.float32),
                     axis=0, keepdims=True)                          # (1, B_blk)
        s2 = jnp.sum(jnp.dot(y * y, seg, preferred_element_type=jnp.float32),
                     axis=0, keepdims=True)                          # (1, B_blk)
        mean_b = s1 * inv_n
        var_b = jnp.maximum(s2 * inv_n - mean_b * mean_b, 0.0)
        rstd_b = jax.lax.rsqrt(var_b + EPS)
        # Broadcast per-sample scalars back onto their T-lane segments (MXU).
        mean_l = jnp.dot(mean_b, segT, preferred_element_type=jnp.float32)  # (1, Ttot)
        rstd_l = jnp.dot(rstd_b, segT, preferred_element_type=jnp.float32)  # (1, Ttot)
        return g * ((y - mean_l) * rstd_l) + bt

    def kernel(x_ref, seg_ref, segT_ref,
               w1_ref, b1_ref, g1_ref, bt1_ref,
               wd_ref, bd_ref, g2_ref, bt2_ref,
               w2_ref, b2_ref, alpha_ref,
               o_ref):
        x = x_ref[...].astype(jnp.float32)                           # (C_in, Ttot)
        seg = seg_ref[...]                                           # (Ttot, B_blk)
        segT = segT_ref[...]                                         # (B_blk, Ttot)
        a1 = alpha_ref[0]                                            # SMEM scalars
        a2 = alpha_ref[1]

        # ---- conv1: 1x1 pointwise conv == wide channel matmul (scale == 1) ----
        y = jnp.dot(w1_ref[...], x, preferred_element_type=jnp.float32) + b1_ref[...]

        # ---- PReLU + cLN (per-sample mean/var over (C, T)) ----
        y = jnp.where(y > 0, y, a1 * y)
        y = cln(y, seg, segT, g1_ref[...], bt1_ref[...])

        # ---- depthwise conv1d: K shifted copies; zero padding via per-sample mask ----
        t_loc = jax.lax.broadcasted_iota(jnp.int32, (C_conv, Ttot), 1) % T
        acc = jnp.zeros((C_conv, Ttot), jnp.float32)
        for k in range(K):
            s = k * dilation - pad_left          # this tap reads y[:, t + s]
            w_k = wd_ref[k]                      # (C_conv, 1) tap column
            if s == 0:
                acc = acc + y * w_k              # center tap: no roll, no mask
            else:
                shifted = pltpu.roll(y, shift=(-s) % Ttot, axis=1)
                if s > 0:
                    valid = t_loc < (T - s)
                else:
                    valid = t_loc >= (-s)
                acc = acc + jnp.where(valid, shifted * w_k, 0.0)
        z = acc + bd_ref[...]

        # ---- PReLU + cLN ----
        z = jnp.where(z > 0, z, a2 * z)
        z = cln(z, seg, segT, g2_ref[...], bt2_ref[...])

        # ---- conv2: 1x1 pointwise back to C_in + residual ----
        out = jnp.dot(w2_ref[...], z, preferred_element_type=jnp.float32) + b2_ref[...]
        o_ref[...] = (out + x).astype(o_ref.dtype)

    return kernel


def conv1d_block(x, params, *, kernel_size=3, dilation=1, causal=False,
                 block_batch=4):
    """Forward pass of Conv1dBlock.  x: (N, C_in, T) float32."""
    N, C_in, T = x.shape
    (w1, b1, a1, g1, bt1, wd, bd, a2, g2, bt2, w2, b2) = params
    C_conv = w1.shape[0]
    K = kernel_size
    pad = dilation * (K - 1)
    if not causal:
        assert pad % 2 == 0, "non-causal path requires dilation*(K-1) even (odd K)"
    pad_left = pad if causal else pad // 2

    # ---- batch folding: (N, C, T) -> lane-dense (C, Npad*T) slab ----
    # Keep grid extent >= 2 when possible (shards across TensorCores on v7x).
    B_blk = max(1, min(block_batch, N // 2 if N >= 2 else 1))
    Npad = -(-N // B_blk) * B_blk
    if Npad != N:
        x = jnp.pad(x, ((0, Npad - N), (0, 0), (0, 0)))
    x2 = jnp.transpose(x, (1, 0, 2)).reshape(C_in, Npad * T)
    G = Npad // B_blk
    Ttot = B_blk * T

    # Segment matrices for per-sample cLN reduction / broadcast-back.
    seg = (jnp.arange(Ttot, dtype=jnp.int32)[:, None] // T
           == jnp.arange(B_blk, dtype=jnp.int32)[None, :]).astype(jnp.float32)
    segT = jnp.transpose(seg)

    col = lambda v: jnp.asarray(v, jnp.float32).reshape(-1, 1)
    wd_cols = jnp.transpose(jnp.asarray(wd, jnp.float32).reshape(C_conv, K))[..., None]  # (K, C_conv, 1)
    alphas = jnp.stack([jnp.asarray(a1, jnp.float32).reshape(()),
                        jnp.asarray(a2, jnp.float32).reshape(())])   # (2,) -> SMEM

    def const(shape):
        nd = len(shape)
        return pl.BlockSpec(shape, lambda i, _nd=nd: (0,) * _nd)

    in_specs = [
        pl.BlockSpec((C_in, Ttot), lambda i: (0, i)),          # x slab tile
        const((Ttot, B_blk)),    # seg
        const((B_blk, Ttot)),    # segT
        const((C_conv, C_in)),   # w1
        const((C_conv, 1)),      # b1
        const((C_conv, 1)),      # gamma1
        const((C_conv, 1)),      # beta1
        const((K, C_conv, 1)),   # depthwise weights (per-tap columns)
        const((C_conv, 1)),      # depthwise bias
        const((C_conv, 1)),      # gamma2
        const((C_conv, 1)),      # beta2
        const((C_in, C_conv)),   # w2
        const((C_in, 1)),        # b2
        pl.BlockSpec(memory_space=pltpu.MemorySpace.SMEM),     # PReLU alphas
    ]
    out_spec = pl.BlockSpec((C_in, Ttot), lambda i: (0, i))

    kern = _make_kernel(C_in, C_conv, T, B_blk, K, dilation, pad_left)

    flops = G * Ttot * (4 * C_in * C_conv + 2 * C_conv * K + 16 * C_conv)
    bytes_accessed = (2 * C_in * Npad * T + 2 * C_in * C_conv + 8 * C_conv
                      + 2 * Ttot * B_blk) * 4
    cost = pl.CostEstimate(flops=int(flops), transcendentals=int(2 * Npad),
                           bytes_accessed=int(bytes_accessed))

    o2 = pl.pallas_call(
        kern,
        out_shape=jax.ShapeDtypeStruct((C_in, Npad * T), x.dtype),
        grid_spec=pltpu.PrefetchScalarGridSpec(
            num_scalar_prefetch=0,
            grid=(G,),
            in_specs=in_specs,
            out_specs=out_spec,
        ),
        compiler_params=pltpu.CompilerParams(dimension_semantics=("parallel",)),
        cost_estimate=cost,
    )(x2, seg, segT, w1, col(b1), col(g1), col(bt1),
      wd_cols, col(bd), col(g2), col(bt2), w2, col(b2), alphas)

    out = jnp.transpose(o2.reshape(C_in, Npad, T), (1, 0, 2))
    return out[:N]


def ref_forward(x, params, *, kernel_size=3, dilation=1, causal=False):
    """Pure-JAX reference mirroring the PyTorch forward (norm='cLN')."""
    (w1, b1, a1, g1, bt1, wd, bd, a2, g2, bt2, w2, b2) = params
    N, C_in, T = x.shape
    K = kernel_size
    pad = dilation * (K - 1)
    p_l, p_r = (pad, 0) if causal else (pad // 2, pad // 2)
    hp = jax.lax.Precision.HIGHEST

    y = jnp.einsum('oc,nct->not', w1, x, precision=hp) + b1[None, :, None]
    y = jnp.where(y > 0, y, a1 * y)
    m = jnp.mean(y, axis=(1, 2), keepdims=True)
    v = jnp.mean((y - m) ** 2, axis=(1, 2), keepdims=True)
    y = g1[None, :, None] * (y - m) / jnp.sqrt(v + EPS) + bt1[None, :, None]

    yp = jnp.pad(y, ((0, 0), (0, 0), (p_l, p_r)))
    z = sum(wd[None, :, k:k + 1] * yp[:, :, k * dilation:k * dilation + T]
            for k in range(K)) + bd[None, :, None]

    z = jnp.where(z > 0, z, a2 * z)
    m2 = jnp.mean(z, axis=(1, 2), keepdims=True)
    v2 = jnp.mean((z - m2) ** 2, axis=(1, 2), keepdims=True)
    z = g2[None, :, None] * (z - m2) / jnp.sqrt(v2 + EPS) + bt2[None, :, None]

    out = jnp.einsum('oc,nct->not', w2, z, precision=hp) + b2[None, :, None]
    return out + x


if __name__ == "__main__":
    N, C_in, C_conv, T, K, D = 8, 16, 32, 128, 3, 1

    key = jax.random.PRNGKey(0)
    keys = jax.random.split(key, 12)
    x = jax.random.normal(keys[0], (N, C_in, T), jnp.float32)

    # deterministic synthetic parameters (module __init__ shapes)
    w1 = 0.1 * jax.random.normal(keys[1], (C_conv, C_in), jnp.float32)   # conv1 weight (1x1)
    b1 = 0.1 * jax.random.normal(keys[2], (C_conv,), jnp.float32)        # conv1 bias
    a1 = jnp.float32(0.25)                                               # PReLU (num_parameters=1)
    g1 = 1.0 + 0.1 * jax.random.normal(keys[3], (C_conv,), jnp.float32)  # GroupNorm weight
    bt1 = 0.1 * jax.random.normal(keys[4], (C_conv,), jnp.float32)       # GroupNorm bias
    wd = 0.1 * jax.random.normal(keys[5], (C_conv, K), jnp.float32)      # depthwise weight (C,1,K) squeezed
    bd = 0.1 * jax.random.normal(keys[6], (C_conv,), jnp.float32)        # depthwise bias
    a2 = jnp.float32(0.25)
    g2 = 1.0 + 0.1 * jax.random.normal(keys[7], (C_conv,), jnp.float32)
    bt2 = 0.1 * jax.random.normal(keys[8], (C_conv,), jnp.float32)
    w2 = 0.1 * jax.random.normal(keys[9], (C_in, C_conv), jnp.float32)   # conv2 weight (1x1)
    b2 = 0.1 * jax.random.normal(keys[10], (C_in,), jnp.float32)         # conv2 bias
    params = (w1, b1, a1, g1, bt1, wd, bd, a2, g2, bt2, w2, b2)

    out = conv1d_block(x, params, kernel_size=K, dilation=D, block_batch=4)
    out = jax.block_until_ready(out)

    ref = ref_forward(x, params, kernel_size=K, dilation=D)
    np.testing.assert_allclose(np.asarray(out), np.asarray(ref), rtol=5e-2, atol=5e-2)

    print("KERNEL_OK")
</pallas_src>

<mosaic_0001>
module attributes {stable_mosaic.version = 11 : i64} {
  func.func @kernel(%arg0: i32, %arg1: memref<16x512xf32, #tpu.memory_space<vmem>>, %arg2: memref<512x4xf32, #tpu.memory_space<vmem>>, %arg3: memref<4x512xf32, #tpu.memory_space<vmem>>, %arg4: memref<32x16xf32, #tpu.memory_space<vmem>>, %arg5: memref<32x1xf32, #tpu.memory_space<vmem>>, %arg6: memref<32x1xf32, #tpu.memory_space<vmem>>, %arg7: memref<32x1xf32, #tpu.memory_space<vmem>>, %arg8: memref<3x32x1xf32, #tpu.memory_space<vmem>>, %arg9: memref<32x1xf32, #tpu.memory_space<vmem>>, %arg10: memref<32x1xf32, #tpu.memory_space<vmem>>, %arg11: memref<32x1xf32, #tpu.memory_space<vmem>>, %arg12: memref<16x32xf32, #tpu.memory_space<vmem>>, %arg13: memref<16x1xf32, #tpu.memory_space<vmem>>, %arg14: memref<2xf32, #tpu.memory_space<smem>>, %arg15: memref<16x512xf32, #tpu.memory_space<vmem>>) attributes {dimension_semantics = [#tpu.dimension_semantics<parallel>], iteration_bounds = array<i64: 2>, scalar_prefetch = 0 : i64, scratch_operands = 0 : i64, tpu.core_type = #tpu.core_type<tc>, window_params = [{transform_indices = @transform_0, window_bounds = array<i64: 16, 512>}, {pipeline_mode = #tpu.pipeline_mode<synchronous>, transform_indices = @transform_1, window_bounds = array<i64: 512, 4>}, {pipeline_mode = #tpu.pipeline_mode<synchronous>, transform_indices = @transform_2, window_bounds = array<i64: 4, 512>}, {pipeline_mode = #tpu.pipeline_mode<synchronous>, transform_indices = @transform_3, window_bounds = array<i64: 32, 16>}, {pipeline_mode = #tpu.pipeline_mode<synchronous>, transform_indices = @transform_4, window_bounds = array<i64: 32, 1>}, {pipeline_mode = #tpu.pipeline_mode<synchronous>, transform_indices = @transform_5, window_bounds = array<i64: 32, 1>}, {pipeline_mode = #tpu.pipeline_mode<synchronous>, transform_indices = @transform_6, window_bounds = array<i64: 32, 1>}, {pipeline_mode = #tpu.pipeline_mode<synchronous>, transform_indices = @transform_7, window_bounds = array<i64: 3, 32, 1>}, {pipeline_mode = #tpu.pipeline_mode<synchronous>, transform_indices = @transform_8, window_bounds = array<i64: 32, 1>}, {pipeline_mode = #tpu.pipeline_mode<synchronous>, transform_indices = @transform_9, window_bounds = array<i64: 32, 1>}, {pipeline_mode = #tpu.pipeline_mode<synchronous>, transform_indices = @transform_10, window_bounds = array<i64: 32, 1>}, {pipeline_mode = #tpu.pipeline_mode<synchronous>, transform_indices = @transform_11, window_bounds = array<i64: 16, 32>}, {pipeline_mode = #tpu.pipeline_mode<synchronous>, transform_indices = @transform_12, window_bounds = array<i64: 16, 1>}, {transform_indices = @transform_13, window_bounds = array<i64: 2>}, {transform_indices = @transform_14, window_bounds = array<i64: 16, 512>}]} {
    %c0 = arith.constant 0 : index
    %c0_0 = arith.constant 0 : index
    %0 = vector.load %arg1[%c0, %c0_0] : memref<16x512xf32, #tpu.memory_space<vmem>>, vector<16x512xf32>
    %c0_1 = arith.constant 0 : index
    %c0_2 = arith.constant 0 : index
    %1 = vector.load %arg2[%c0_1, %c0_2] : memref<512x4xf32, #tpu.memory_space<vmem>>, vector<512x4xf32>
    %c0_3 = arith.constant 0 : index
    %c0_4 = arith.constant 0 : index
    %2 = vector.load %arg3[%c0_3, %c0_4] : memref<4x512xf32, #tpu.memory_space<vmem>>, vector<4x512xf32>
    %c0_5 = arith.constant 0 : index
    %3 = memref.load %arg14[%c0_5] : memref<2xf32, #tpu.memory_space<smem>>
    %c1 = arith.constant 1 : index
    %4 = memref.load %arg14[%c1] : memref<2xf32, #tpu.memory_space<smem>>
    %c0_6 = arith.constant 0 : index
    %c0_7 = arith.constant 0 : index
    %5 = vector.load %arg4[%c0_6, %c0_7] : memref<32x16xf32, #tpu.memory_space<vmem>>, vector<32x16xf32>
    %cst = arith.constant dense<0.000000e+00> : vector<32x512xf32>
    %6 = tpu.matmul %5, %0, %cst {dimension_numbers = #tpu.dot_dimension_numbers<[1], [0], [0], [1], [0, 0, 1, 1], [], []>} : vector<32x16xf32>, vector<16x512xf32>, vector<32x512xf32> -> vector<32x512xf32>
    %c0_8 = arith.constant 0 : index
    %c0_9 = arith.constant 0 : index
    %7 = vector.load %arg5[%c0_8, %c0_9] : memref<32x1xf32, #tpu.memory_space<vmem>>, vector<32x1xf32>
    %8 = vector.broadcast %7 : vector<32x1xf32> to vector<32x512xf32>
    %9 = arith.addf %6, %8 : vector<32x512xf32>
    %cst_10 = arith.constant 0.000000e+00 : f32
    %10 = vector.broadcast %cst_10 : f32 to vector<32x512xf32>
    %11 = arith.cmpf ogt, %9, %10 : vector<32x512xf32>
    %12 = vector.broadcast %3 : f32 to vector<32x512xf32>
    %13 = arith.mulf %12, %9 : vector<32x512xf32>
    %14 = arith.select %11, %9, %13 : vector<32x512xi1>, vector<32x512xf32>
    %c0_11 = arith.constant 0 : index
    %c0_12 = arith.constant 0 : index
    %15 = vector.load %arg6[%c0_11, %c0_12] : memref<32x1xf32, #tpu.memory_space<vmem>>, vector<32x1xf32>
    %c0_13 = arith.constant 0 : index
    %c0_14 = arith.constant 0 : index
    %16 = vector.load %arg7[%c0_13, %c0_14] : memref<32x1xf32, #tpu.memory_space<vmem>>, vector<32x1xf32>
    %cst_15 = arith.constant dense<0.000000e+00> : vector<32x4xf32>
    %17 = tpu.matmul %14, %1, %cst_15 {dimension_numbers = #tpu.dot_dimension_numbers<[1], [0], [0], [1], [0, 0, 1, 1], [], []>} : vector<32x512xf32>, vector<512x4xf32>, vector<32x4xf32> -> vector<32x4xf32>
    %cst_16 = arith.constant dense<0.000000e+00> : vector<4xf32>
    %18 = vector.multi_reduction <add>, %17, %cst_16 [0] : vector<32x4xf32> to vector<4xf32>
    %19 = vector.shape_cast %18 : vector<4xf32> to vector<1x4xf32>
    %20 = arith.mulf %14, %14 : vector<32x512xf32>
    %cst_17 = arith.constant dense<0.000000e+00> : vector<32x4xf32>
    %21 = tpu.matmul %20, %1, %cst_17 {dimension_numbers = #tpu.dot_dimension_numbers<[1], [0], [0], [1], [0, 0, 1, 1], [], []>} : vector<32x512xf32>, vector<512x4xf32>, vector<32x4xf32> -> vector<32x4xf32>
    %cst_18 = arith.constant dense<0.000000e+00> : vector<4xf32>
    %22 = vector.multi_reduction <add>, %21, %cst_18 [0] : vector<32x4xf32> to vector<4xf32>
    %23 = vector.shape_cast %22 : vector<4xf32> to vector<1x4xf32>
    %cst_19 = arith.constant 2.44140625E-4 : f32
    %24 = vector.broadcast %cst_19 : f32 to vector<1x4xf32>
    %25 = arith.mulf %19, %24 : vector<1x4xf32>
    %cst_20 = arith.constant 2.44140625E-4 : f32
    %26 = vector.broadcast %cst_20 : f32 to vector<1x4xf32>
    %27 = arith.mulf %23, %26 : vector<1x4xf32>
    %28 = arith.mulf %25, %25 : vector<1x4xf32>
    %29 = arith.subf %27, %28 : vector<1x4xf32>
    %cst_21 = arith.constant 0.000000e+00 : f32
    %30 = vector.broadcast %cst_21 : f32 to vector<1x4xf32>
    %31 = arith.maximumf %29, %30 : vector<1x4xf32>
    %cst_22 = arith.constant 9.99999974E-6 : f32
    %32 = vector.broadcast %cst_22 : f32 to vector<1x4xf32>
    %33 = arith.addf %31, %32 : vector<1x4xf32>
    %34 = math.rsqrt %33 : vector<1x4xf32>
    %cst_23 = arith.constant dense<0.000000e+00> : vector<1x512xf32>
    %35 = tpu.matmul %25, %2, %cst_23 {dimension_numbers = #tpu.dot_dimension_numbers<[1], [0], [0], [1], [0, 0, 1, 1], [], []>} : vector<1x4xf32>, vector<4x512xf32>, vector<1x512xf32> -> vector<1x512xf32>
    %cst_24 = arith.constant dense<0.000000e+00> : vector<1x512xf32>
    %36 = tpu.matmul %34, %2, %cst_24 {dimension_numbers = #tpu.dot_dimension_numbers<[1], [0], [0], [1], [0, 0, 1, 1], [], []>} : vector<1x4xf32>, vector<4x512xf32>, vector<1x512xf32> -> vector<1x512xf32>
    %37 = vector.broadcast %35 : vector<1x512xf32> to vector<32x512xf32>
    %38 = arith.subf %14, %37 : vector<32x512xf32>
    %39 = vector.broadcast %36 : vector<1x512xf32> to vector<32x512xf32>
    %40 = arith.mulf %38, %39 : vector<32x512xf32>
    %41 = vector.broadcast %15 : vector<32x1xf32> to vector<32x512xf32>
    %42 = arith.mulf %41, %40 : vector<32x512xf32>
    %43 = vector.broadcast %16 : vector<32x1xf32> to vector<32x512xf32>
    %44 = arith.addf %42, %43 : vector<32x512xf32>
    %45 = tpu.iota {dimensions = array<i32: 1>} : vector<32x512xi32>
    %c128_i32 = arith.constant 128 : i32
    %c0_i32 = arith.constant 0 : i32
    %46 = arith.cmpi eq, %c128_i32, %c0_i32 : i32
    %c1_i32 = arith.constant 1 : i32
    %47 = arith.select %46, %c1_i32, %c128_i32 : i32
    %48 = vector.broadcast %47 : i32 to vector<32x512xi32>
    %49 = arith.remsi %45, %48 : vector<32x512xi32>
    %c0_i32_25 = arith.constant 0 : i32
    %50 = vector.broadcast %c0_i32_25 : i32 to vector<32x512xi32>
    %51 = arith.cmpi ne, %49, %50 : vector<32x512xi32>
    %c0_i32_26 = arith.constant 0 : i32
    %52 = vector.broadcast %c0_i32_26 : i32 to vector<32x512xi32>
    %53 = arith.cmpi slt, %49, %52 : vector<32x512xi32>
    %c0_i32_27 = arith.constant 0 : i32
    %54 = arith.cmpi slt, %47, %c0_i32_27 : i32
    %55 = vector.broadcast %54 : i1 to vector<32x512xi1>
    %56 = vector.broadcast %55 : vector<32x512xi1> to vector<32x512xi1>
    %57 = arith.xori %53, %56 : vector<32x512xi1>
    %58 = arith.andi %57, %51 : vector<32x512xi1>
    %59 = vector.broadcast %47 : i32 to vector<32x512xi32>
    %60 = arith.addi %49, %59 : vector<32x512xi32>
    %61 = arith.select %58, %60, %49 : vector<32x512xi1>, vector<32x512xi32>
    %cst_28 = arith.constant 0.000000e+00 : f32
    %62 = vector.broadcast %cst_28 : f32 to vector<32x512xf32>
    %c0_29 = arith.constant 0 : index
    %c0_30 = arith.constant 0 : index
    %c0_31 = arith.constant 0 : index
    %63 = vector.load %arg8[%c0_29, %c0_30, %c0_31] : memref<3x32x1xf32, #tpu.memory_space<vmem>>, vector<1x32x1xf32>
    %64 = vector.shape_cast %63 : vector<1x32x1xf32> to vector<32x1xf32>
    %c1_i32_32 = arith.constant 1 : i32
    %65 = tpu.dynamic_rotate %44 by %c1_i32_32 dim 1 : vector<32x512xf32>, i32 -> vector<32x512xf32>
    %c1_i32_33 = arith.constant 1 : i32
    %66 = vector.broadcast %c1_i32_33 : i32 to vector<32x512xi32>
    %67 = arith.cmpi sge, %61, %66 : vector<32x512xi32>
    %68 = vector.broadcast %64 : vector<32x1xf32> to vector<32x512xf32>
    %69 = arith.mulf %65, %68 : vector<32x512xf32>
    %cst_34 = arith.constant 0.000000e+00 : f32
    %70 = vector.broadcast %cst_34 : f32 to vector<32x512xf32>
    %71 = arith.select %67, %69, %70 : vector<32x512xi1>, vector<32x512xf32>
    %72 = arith.addf %62, %71 : vector<32x512xf32>
    %c1_35 = arith.constant 1 : index
    %c0_36 = arith.constant 0 : index
    %c0_37 = arith.constant 0 : index
    %73 = vector.load %arg8[%c1_35, %c0_36, %c0_37] : memref<3x32x1xf32, #tpu.memory_space<vmem>>, vector<1x32x1xf32>
    %74 = vector.shape_cast %73 : vector<1x32x1xf32> to vector<32x1xf32>
    %75 = vector.broadcast %74 : vector<32x1xf32> to vector<32x512xf32>
    %76 = arith.mulf %44, %75 : vector<32x512xf32>
    %77 = arith.addf %72, %76 : vector<32x512xf32>
    %c2 = arith.constant 2 : index
    %c0_38 = arith.constant 0 : index
    %c0_39 = arith.constant 0 : index
    %78 = vector.load %arg8[%c2, %c0_38, %c0_39] : memref<3x32x1xf32, #tpu.memory_space<vmem>>, vector<1x32x1xf32>
    %79 = vector.shape_cast %78 : vector<1x32x1xf32> to vector<32x1xf32>
    %c511_i32 = arith.constant 511 : i32
    %80 = tpu.dynamic_rotate %44 by %c511_i32 dim 1 : vector<32x512xf32>, i32 -> vector<32x512xf32>
    %c127_i32 = arith.constant 127 : i32
    %81 = vector.broadcast %c127_i32 : i32 to vector<32x512xi32>
    %82 = arith.cmpi slt, %61, %81 : vector<32x512xi32>
    %83 = vector.broadcast %79 : vector<32x1xf32> to vector<32x512xf32>
    %84 = arith.mulf %80, %83 : vector<32x512xf32>
    %cst_40 = arith.constant 0.000000e+00 : f32
    %85 = vector.broadcast %cst_40 : f32 to vector<32x512xf32>
    %86 = arith.select %82, %84, %85 : vector<32x512xi1>, vector<32x512xf32>
    %87 = arith.addf %77, %86 : vector<32x512xf32>
    %c0_41 = arith.constant 0 : index
    %c0_42 = arith.constant 0 : index
    %88 = vector.load %arg9[%c0_41, %c0_42] : memref<32x1xf32, #tpu.memory_space<vmem>>, vector<32x1xf32>
    %89 = vector.broadcast %88 : vector<32x1xf32> to vector<32x512xf32>
    %90 = arith.addf %87, %89 : vector<32x512xf32>
    %cst_43 = arith.constant 0.000000e+00 : f32
    %91 = vector.broadcast %cst_43 : f32 to vector<32x512xf32>
    %92 = arith.cmpf ogt, %90, %91 : vector<32x512xf32>
    %93 = vector.broadcast %4 : f32 to vector<32x512xf32>
    %94 = arith.mulf %93, %90 : vector<32x512xf32>
    %95 = arith.select %92, %90, %94 : vector<32x512xi1>, vector<32x512xf32>
    %c0_44 = arith.constant 0 : index
    %c0_45 = arith.constant 0 : index
    %96 = vector.load %arg10[%c0_44, %c0_45] : memref<32x1xf32, #tpu.memory_space<vmem>>, vector<32x1xf32>
    %c0_46 = arith.constant 0 : index
    %c0_47 = arith.constant 0 : index
    %97 = vector.load %arg11[%c0_46, %c0_47] : memref<32x1xf32, #tpu.memory_space<vmem>>, vector<32x1xf32>
    %cst_48 = arith.constant dense<0.000000e+00> : vector<32x4xf32>
    %98 = tpu.matmul %95, %1, %cst_48 {dimension_numbers = #tpu.dot_dimension_numbers<[1], [0], [0], [1], [0, 0, 1, 1], [], []>} : vector<32x512xf32>, vector<512x4xf32>, vector<32x4xf32> -> vector<32x4xf32>
    %cst_49 = arith.constant dense<0.000000e+00> : vector<4xf32>
    %99 = vector.multi_reduction <add>, %98, %cst_49 [0] : vector<32x4xf32> to vector<4xf32>
    %100 = vector.shape_cast %99 : vector<4xf32> to vector<1x4xf32>
    %101 = arith.mulf %95, %95 : vector<32x512xf32>
    %cst_50 = arith.constant dense<0.000000e+00> : vector<32x4xf32>
    %102 = tpu.matmul %101, %1, %cst_50 {dimension_numbers = #tpu.dot_dimension_numbers<[1], [0], [0], [1], [0, 0, 1, 1], [], []>} : vector<32x512xf32>, vector<512x4xf32>, vector<32x4xf32> -> vector<32x4xf32>
    %cst_51 = arith.constant dense<0.000000e+00> : vector<4xf32>
    %103 = vector.multi_reduction <add>, %102, %cst_51 [0] : vector<32x4xf32> to vector<4xf32>
    %104 = vector.shape_cast %103 : vector<4xf32> to vector<1x4xf32>
    %cst_52 = arith.constant 2.44140625E-4 : f32
    %105 = vector.broadcast %cst_52 : f32 to vector<1x4xf32>
    %106 = arith.mulf %100, %105 : vector<1x4xf32>
    %cst_53 = arith.constant 2.44140625E-4 : f32
    %107 = vector.broadcast %cst_53 : f32 to vector<1x4xf32>
    %108 = arith.mulf %104, %107 : vector<1x4xf32>
    %109 = arith.mulf %106, %106 : vector<1x4xf32>
    %110 = arith.subf %108, %109 : vector<1x4xf32>
    %cst_54 = arith.constant 0.000000e+00 : f32
    %111 = vector.broadcast %cst_54 : f32 to vector<1x4xf32>
    %112 = arith.maximumf %110, %111 : vector<1x4xf32>
    %cst_55 = arith.constant 9.99999974E-6 : f32
    %113 = vector.broadcast %cst_55 : f32 to vector<1x4xf32>
    %114 = arith.addf %112, %113 : vector<1x4xf32>
    %115 = math.rsqrt %114 : vector<1x4xf32>
    %cst_56 = arith.constant dense<0.000000e+00> : vector<1x512xf32>
    %116 = tpu.matmul %106, %2, %cst_56 {dimension_numbers = #tpu.dot_dimension_numbers<[1], [0], [0], [1], [0, 0, 1, 1], [], []>} : vector<1x4xf32>, vector<4x512xf32>, vector<1x512xf32> -> vector<1x512xf32>
    %cst_57 = arith.constant dense<0.000000e+00> : vector<1x512xf32>
    %117 = tpu.matmul %115, %2, %cst_57 {dimension_numbers = #tpu.dot_dimension_numbers<[1], [0], [0], [1], [0, 0, 1, 1], [], []>} : vector<1x4xf32>, vector<4x512xf32>, vector<1x512xf32> -> vector<1x512xf32>
    %118 = vector.broadcast %116 : vector<1x512xf32> to vector<32x512xf32>
    %119 = arith.subf %95, %118 : vector<32x512xf32>
    %120 = vector.broadcast %117 : vector<1x512xf32> to vector<32x512xf32>
    %121 = arith.mulf %119, %120 : vector<32x512xf32>
    %122 = vector.broadcast %96 : vector<32x1xf32> to vector<32x512xf32>
    %123 = arith.mulf %122, %121 : vector<32x512xf32>
    %124 = vector.broadcast %97 : vector<32x1xf32> to vector<32x512xf32>
    %125 = arith.addf %123, %124 : vector<32x512xf32>
    %c0_58 = arith.constant 0 : index
    %c0_59 = arith.constant 0 : index
    %126 = vector.load %arg12[%c0_58, %c0_59] : memref<16x32xf32, #tpu.memory_space<vmem>>, vector<16x32xf32>
    %cst_60 = arith.constant dense<0.000000e+00> : vector<16x512xf32>
    %127 = tpu.matmul %126, %125, %cst_60 {dimension_numbers = #tpu.dot_dimension_numbers<[1], [0], [0], [1], [0, 0, 1, 1], [], []>} : vector<16x32xf32>, vector<32x512xf32>, vector<16x512xf32> -> vector<16x512xf32>
    %c0_61 = arith.constant 0 : index
    %c0_62 = arith.constant 0 : index
    %128 = vector.load %arg13[%c0_61, %c0_62] : memref<16x1xf32, #tpu.memory_space<vmem>>, vector<16x1xf32>
    %129 = vector.broadcast %128 : vector<16x1xf32> to vector<16x512xf32>
    %130 = arith.addf %127, %129 : vector<16x512xf32>
    %131 = arith.addf %130, %0 : vector<16x512xf32>
    %c0_63 = arith.constant 0 : index
    %c0_64 = arith.constant 0 : index
    %132 = vector.load %arg15[%c0_63, %c0_64] : memref<16x512xf32, #tpu.memory_space<vmem>>, vector<16x512xf32>
    tpu.vector_store %arg15[%c0_63, %c0_64], %131 {strides = array<i32>} : memref<16x512xf32, #tpu.memory_space<vmem>>, vector<16x512xf32>,
    return
  }
  func.func @transform_0(%arg0: i32) -> (i32, i32) {
    %c0_i32 = arith.constant 0 : i32
    %c0_i32_0 = arith.constant 0 : i32
    return %c0_i32, %arg0 : i32, i32
  }
  func.func @transform_1(%arg0: i32) -> (i32, i32) {
    %c0_i32 = arith.constant 0 : i32
    %c0_i32_0 = arith.constant 0 : i32
    %c0_i32_1 = arith.constant 0 : i32
    return %c0_i32, %c0_i32_0 : i32, i32
  }
  func.func @transform_2(%arg0: i32) -> (i32, i32) {
    %c0_i32 = arith.constant 0 : i32
    %c0_i32_0 = arith.constant 0 : i32
    %c0_i32_1 = arith.constant 0 : i32
    return %c0_i32, %c0_i32_0 : i32, i32
  }
  func.func @transform_3(%arg0: i32) -> (i32, i32) {
    %c0_i32 = arith.constant 0 : i32
    %c0_i32_0 = arith.constant 0 : i32
    %c0_i32_1 = arith.constant 0 : i32
    return %c0_i32, %c0_i32_0 : i32, i32
  }
  func.func @transform_4(%arg0: i32) -> (i32, i32) {
    %c0_i32 = arith.constant 0 : i32
    %c0_i32_0 = arith.constant 0 : i32
    %c0_i32_1 = arith.constant 0 : i32
    return %c0_i32, %c0_i32_0 : i32, i32
  }
  func.func @transform_5(%arg0: i32) -> (i32, i32) {
    %c0_i32 = arith.constant 0 : i32
    %c0_i32_0 = arith.constant 0 : i32
    %c0_i32_1 = arith.constant 0 : i32
    return %c0_i32, %c0_i32_0 : i32, i32
  }
  func.func @transform_6(%arg0: i32) -> (i32, i32) {
    %c0_i32 = arith.constant 0 : i32
    %c0_i32_0 = arith.constant 0 : i32
    %c0_i32_1 = arith.constant 0 : i32
    return %c0_i32, %c0_i32_0 : i32, i32
  }
  func.func @transform_7(%arg0: i32) -> (i32, i32, i32) {
    %c0_i32 = arith.constant 0 : i32
    %c0_i32_0 = arith.constant 0 : i32
    %c0_i32_1 = arith.constant 0 : i32
    %c0_i32_2 = arith.constant 0 : i32
    return %c0_i32, %c0_i32_0, %c0_i32_1 : i32, i32, i32
  }
  func.func @transform_8(%arg0: i32) -> (i32, i32) {
    %c0_i32 = arith.constant 0 : i32
    %c0_i32_0 = arith.constant 0 : i32
    %c0_i32_1 = arith.constant 0 : i32
    return %c0_i32, %c0_i32_0 : i32, i32
  }
  func.func @transform_9(%arg0: i32) -> (i32, i32) {
    %c0_i32 = arith.constant 0 : i32
    %c0_i32_0 = arith.constant 0 : i32
    %c0_i32_1 = arith.constant 0 : i32
    return %c0_i32, %c0_i32_0 : i32, i32
  }
  func.func @transform_10(%arg0: i32) -> (i32, i32) {
    %c0_i32 = arith.constant 0 : i32
    %c0_i32_0 = arith.constant 0 : i32
    %c0_i32_1 = arith.constant 0 : i32
    return %c0_i32, %c0_i32_0 : i32, i32
  }
  func.func @transform_11(%arg0: i32) -> (i32, i32) {
    %c0_i32 = arith.constant 0 : i32
    %c0_i32_0 = arith.constant 0 : i32
    %c0_i32_1 = arith.constant 0 : i32
    return %c0_i32, %c0_i32_0 : i32, i32
  }
  func.func @transform_12(%arg0: i32) -> (i32, i32) {
    %c0_i32 = arith.constant 0 : i32
    %c0_i32_0 = arith.constant 0 : i32
    %c0_i32_1 = arith.constant 0 : i32
    return %c0_i32, %c0_i32_0 : i32, i32
  }
  func.func @transform_13(%arg0: i32) -> i32 {
    %c0_i32 = arith.constant 0 : i32
    %c0_i32_0 = arith.constant 0 : i32
    return %c0_i32 : i32
  }
  func.func @transform_14(%arg0: i32) -> (i32, i32) {
    %c0_i32 = arith.constant 0 : i32
    %c0_i32_0 = arith.constant 0 : i32
    return %c0_i32, %arg0 : i32, i32
  }
}

</mosaic_0001>

<bundles_post_ra>
// kernel: tpu_custom_call.1
= control target key start
LH: loop header
LB: loop body
LE: loop exit
PB: predicated region body
PF: predicated region fallthrough
CT: control target
= control target key end

     0   :  { %s5756_s0 = inlined_call_operand.vmem [shape: f32[16,1024], index: 0, kind: input, shape index: {}]   ;;  %s5757_s1 = inlined_call_operand.vmem [shape: f32[512,4], index: 1, kind: input, shape index: {}]   ;;  %s5758_s2 = inlined_call_operand.vmem [shape: f32[4,512], index: 2, kind: input, shape index: {}]   ;;  %s5759_s3 = inlined_call_operand.vmem [shape: f32[32,16], index: 3, kind: input, shape index: {}]   ;;  %s5760_s4 = inlined_call_operand.vmem [shape: f32[32,1], index: 4, kind: input, shape index: {}]   ;;  %s5761_s5 = inlined_call_operand.vmem [shape: f32[32,1], index: 5, kind: input, shape index: {}]   ;;  %s5762_s6 = inlined_call_operand.vmem [shape: f32[32,1], index: 6, kind: input, shape index: {}]   ;;  %s5763_s7 = inlined_call_operand.vmem [shape: f32[3,32,1], index: 7, kind: input, shape index: {}]   ;;  %s5764_s8 = inlined_call_operand.vmem [shape: f32[32,1], index: 8, kind: input, shape index: {}]   ;;  %s5765_s9 = inlined_call_operand.vmem [shape: f32[32,1], index: 9, kind: input, shape index: {}]   ;;  %s5766_s10 = inlined_call_operand.vmem [shape: f32[32,1], index: 10, kind: input, shape index: {}]   ;;  %s5767_s11 = inlined_call_operand.vmem [shape: f32[16,32], index: 11, kind: input, shape index: {}]   ;;  %s5768_s12 = inlined_call_operand.vmem [shape: f32[16,1], index: 12, kind: input, shape index: {}]   ;;  %s5769_s13 = inlined_call_operand.vmem [shape: f32[2], index: 13, kind: input, shape index: {}]   ;;  %s5770_s14 = inlined_call_operand.hbm [shape: f32[16,1024], index: 14, kind: output, shape index: {}]  }
   0x1   :  { %5852 = sst [smem:[#allocation58_spill]] %s5756_s0 }
   0x2   :  { %5853 = sst [smem:[#allocation59_spill]] %s5759_s3 }
   0x3   :  { %5854 = sst [smem:[#allocation60_spill]] %s5769_s13 }
   0x4   :  { %19 = vsyncpa [#allocation5], 0 }
   0x5   :  { %20 = vsyncpa [#allocation4], 0 }
   0x6   :  { %22 = vsyncpa [#allocation4 + $0x1], 0  ;;  %s3974_s29 = smov 0   ;;  %s3976_s30 = smov 0  }
   0x7   :  { %s3978_s15 = smov 0   ;;  %s3980_s16 = smov 0  }
   0x8 LB: > { %s3995_s17 = sadd.s32 4294967295, %s3888_s16   ;;  %s3255_s18 = sadd.s32 4294967294, %s3888_s16   ;;  %s3888_s16 = sphi %s3980_s16, %s6000_s16   ;;  %s3884_s15 = sphi %s3978_s15, %s6004_s15   ;;  %s3880_s30 = sphi %s3976_s30, %s6003_s30   ;;  %s3876_s29 = sphi %s3974_s29, %s6002_s29  }
   0x9   : > { %s3999_s19 = sadd.s32 1, %s3888_s16   ;;  %s35_s20 = sadd.s32 1, %s3884_s15 }
   0xa   : > { %5855 = sst [smem:[#allocation9_spill]] %s3999_s19  ;;  %s32_s21 = ssub.s32 %s3888_s16, %s3999_s19 }
   0xb   : > { %p42_p0 = scmp.ne.s32.totalorder %s3884_s15, %s3880_s30  ;;  %p33_p1 = scmp.eq.s32.totalorder %s32_s21, 0 }
   0xc   : > { %p43_p2 = scmp.eq.s32.totalorder %s3888_s16, 0  ;;  %p345_p3 = scmp.eq.s32.totalorder %s3995_s17, 1 }
   0xd   : > { %p350_p4 = scmp.ne.s32.totalorder %s3880_s30, %s3876_s29  ;;  %p351_p7 = scmp.eq.s32.totalorder %s3255_s18, 1 }
   0xe   : > { %s4011_s22 = scalar_select %p33_p1, %s3884_s15, %s35_s20  }
   0xf   : > { %p4013_p5 = por %p43_p2, %p42_p0  ;;  %p4017_p6 = por %p345_p3, %p42_p0 }
  0x10   : > { %5856 = sst [smem:[#allocation10_spill]] %s4011_s22  ;;  %p3256_p8 = scmp.ge.s32.totalorder %s3888_s16, 1 }
  0x11   : > { %s5858_s24 = scalar_select %p4017_p6, 1, 0 }
  0x12   : > { %p358_p9 = scmp.lt.s32.totalorder %s3888_s16, 3  ;;  %p4023_p10 = por %p351_p7, %p350_p4 }
  0x13   : > { %p3684_p11 = scmp.eq.s32.totalorder %s3995_s17, 0  ;;  %s5861_s13 = sld [smem:[#allocation60_spill]] }
  0x14   : > { %s5859_s25 = scalar_select %p4023_p10, 1, 0 }
  0x15   : > { %p4028_p12 = pnand %p3256_p8, %p358_p9 }
  0x17   : > { %p3676_p13 = pneg %p4028_p12 }
  0x19   : > { %s407_s20 = sshll.u32 %s5861_s13, 4  ;;  %p3677_p0 = pnand %p3684_p11, %p3676_p13  ;;  %s408_s20 = int_to_ptr.vmem [resolvable:$true] %s407_s20 }
  0x1a   : > { %s3809_s18 = scalar_lea.vmem %s408_s20, 16  ;;  %p3817_p7 = scmp.lt.s32.totalorder %s408_s20, %s408_s20 }
  0x1b   : > { %p3810_p1 = scmp.ne.s32.totalorder %s408_s20, %s3809_s18  ;;  %p3811_p2 = pneg %p3677_p0 }
  0x1c   : > { %p3818_p8 = scmp.lt.s32.totalorder %s3809_s18, %s3809_s18 }
  0x1d   : > { %p3812_p3 = pnand %p3811_p2, %p3810_p1 }
  0x1e   : > { %p3819_p9 = por %p3818_p8, %p3817_p7 }
  0x1f   : > { %p3813_p4 = pneg %p3812_p3 }
  0x21   : > { %p3820_p10 = pnand %p3819_p9, %p3813_p4 }
  0x23   : > { %3823 = shalt.err (!%p3820_p10)
}
  0x24   : > { %s3890_s21 = smov [#allocation3]   ;;  %p3258_p6 = scmp.ge.s32.totalorder %s3888_s16, 2 }
  0x25   : > { %3679 = dma.vmem_to_smem (!%p3677_p0), %s408_s20, 16, %s3890_s21, [#allocation5]  }
  0x26   : > { %414 = sbr.rel (%p3258_p6) target bundleno = 57 (0x39), region = 68 }
  0x2b   : > { %417 = sbr.rel (!%p4013_p5) target bundleno = 57 (0x39), region = 72  ;;  %s419_s27 = sand.u32 (%p4013_p5), 1, %s3884_s15  }
  0x2c   : > { %s3316_s28 = sshll.u32 (%p4013_p5), %s3888_s16, 5  ;;  %s3259_s13 = sshll.u32 (%p4013_p5), %s419_s27, 6 }
  0x2d   : > { %s5862_s0 = sld [smem:[#allocation58_spill]] (%p4013_p5)  ;;  %s421_s20 = scalar_lea.vmem (%p4013_p5), [#allocation2], %s3259_s13 }
  0x33   : > { %s424_s19 = scalar_lea.vmem %s5862_s0, %s3316_s28 }
  0x34   : > { %v437_v0 = vld [vmem:[%s424_s19] sm:$0xff]  ;;  %v439_v1 = vld [vmem:[%s424_s19 + $0x8] sm:$0xff]  ;;  %v441_v2 = vld [vmem:[%s424_s19 + $0x10] sm:$0xff] }
  0x35   : > { %438 = vst [vmem:[%s421_s20] sm:$0xff] %v437_v0  ;;  %440 = vst [vmem:[%s421_s20 + $0x8] sm:$0xff] %v439_v1  ;;  %v443_v3 = vld [vmem:[%s424_s19 + $0x18] sm:$0xff]  ;;  %v445_v4 = vld [vmem:[%s424_s19 + $0x40] sm:$0xff] }
  0x36   : > { %442 = vst [vmem:[%s421_s20 + $0x10] sm:$0xff] %v441_v2  ;;  %v447_v5 = vld [vmem:[%s424_s19 + $0x48] sm:$0xff]  ;;  %444 = vst [vmem:[%s421_s20 + $0x18] sm:$0xff] %v443_v3  ;;  %v449_v6 = vld [vmem:[%s424_s19 + $0x50] sm:$0xff] }
  0x37   : > { %446 = vst [vmem:[%s421_s20 + $0x20] sm:$0xff] %v445_v4  ;;  %448 = vst [vmem:[%s421_s20 + $0x28] sm:$0xff] %v447_v5  ;;  %v451_v7 = vld [vmem:[%s424_s19 + $0x58] sm:$0xff] }
  0x38   : > { %450 = vst [vmem:[%s421_s20 + $0x30] sm:$0xff] %v449_v6  ;;  %452 = vst [vmem:[%s421_s20 + $0x38] sm:$0xff] %v451_v7 }
  0x39 PF: > { %461 = sbr.rel (%p4028_p12) target bundleno = 1641 (0x669), region = 95 }
  0x3e   : > { %s5774_s13 = sand.u32 1, %s3880_s30  }
  0x3f   : > { %s4054_s22 = sshll.u32 %s5774_s13, 6 }
  0x40   : > { %s4057_s23 = scalar_lea.vmem [#allocation2], %s4054_s22 }
  0x41   : > { %3867 = dma.done.wait (%p3684_p11), [#allocation5], 16  }
  0x42   : > { %3869 = vsyncadd (%p3684_p11), [#allocation5], 4294967280 }
  0x43   : > { %474 = sfence }
  0x44   : > { %v521_v8 = vld [vmem:[%s4057_s23 + $0x28] sm:$0xff]  ;;  %v523_v9 = vld [vmem:[%s4057_s23 + $0x38] sm:$0xff]  ;;  %v520_v10 = vld [vmem:[%s4057_s23 + $0x20] sm:$0xff]  ;;  %s5863_s3 = sld [smem:[#allocation59_spill]]  ;;  %vm620_vm0 = vcmask 130048   ;;  %v5775_v17 = vmov 0.0  }
  0x45   : > { %661 = vmatprep.subr.mxu0 %v521_v8  ;;  %750 = vmatprep.subr.mxu1 %v523_v9  ;;  %v522_v11 = vld [vmem:[%s4057_s23 + $0x30] sm:$0xff]  ;;  %v517_v12 = vld [vmem:[%s4057_s23 + $0x8] sm:$0xff]  ;;  %v519_v13 = vld [vmem:[%s4057_s23 + $0x18] sm:$0xff]  ;;  %v3892_v21 = vmov 0   ;;  %s590_s20 = sld [smem:[#allocation3]]  ;;  %s5688_s28 = scalar_lea.vmem [#allocation6], %s4054_s22 }
  0x46   : > { %662 = vmatpush1.msra.mxu0 %v520_v10  ;;  %751 = vmatpush1.msra.mxu1 %v522_v11  ;;  %v516_v14 = vld [vmem:[%s4057_s23] sm:$0xff]  ;;  %v518_v15 = vld [vmem:[%s4057_s23 + $0x10] sm:$0xff]  ;;  %v597_v22 = vld [vmem:[%s5760_s4 + $0x8] sm:$0xff]  ;;  %s5092_s21 = sld [smem:[#allocation3 + $0x1]]  ;;  %s3175_s18 = sshll.u32 %s5688_s28, 4  ;;  %s5696_s18 = int_to_ptr.vmem [resolvable:$true] %s3175_s18 }
  0x47   : > { %663 = vmatprep.subr.mxu0 %v517_v12  ;;  %752 = vmatprep.subr.mxu1 %v519_v13  ;;  %v596_v18 = vld [vmem:[%s5760_s4] sm:$0xff]  ;;  %v598_v19 = vld [vmem:[%s5760_s4 + $0x10] sm:$0xff]  ;;  %v599_v23 = vld [vmem:[%s5760_s4 + $0x18] sm:$0xff]  ;;  %s3317_s22 = sshll.u32 %s3995_s17, 9  ;;  %s5997_s19 = sand.u32 1, %s3880_s30  }
  0x48   : > { %664 = vmatpush1.msra.mxu0 %v516_v14  ;;  %697 = vmatprep.mubr.f32.mxu0 %v5775_v17  ;;  %v860_v25 = vld [vmem:[%s5761_s5] sm:$0xff]  ;;  %v861_v28 = vld [vmem:[%s5761_s5 + $0x8] sm:$0xff]  ;;  %v862_v30 = vld [vmem:[%s5761_s5 + $0x10] sm:$0xff]  ;;  %s3824_s26 = scalar_lea.vmem %s5696_s18, 1024  ;;  %p5998_p10 = scmp.ne.s32.totalorder %s5858_s24, 0 }
  0x49   : > { %753 = vmatpush1.msra.mxu1 %v518_v15  ;;  %786 = vmatprep.mubr.f32.mxu1 %v5775_v17  ;;  %v864_v26 = vld [vmem:[%s5762_s6] sm:$0xff]  ;;  %v865_v29 = vld [vmem:[%s5762_s6 + $0x8] sm:$0xff]  ;;  %v866_v31 = vld [vmem:[%s5762_s6 + $0x10] sm:$0xff]  ;;  %p3825_p5 = scmp.ne.s32.totalorder %s5696_s18, %s3824_s26 }
  0x4a   : > { %v592_v16 = vld [vmem:[%s5863_s3] sm:$0xff]  ;;  %v593_v20 = vld [vmem:[%s5863_s3 + $0x8] sm:$0xff]  ;;  %3727 = vset.pattern.permute.xlu0 %v3892_v21  ;;  %3728 = vset.pattern.permute.xlu1 %v3892_v21  ;;  %v594_v24 = vld [vmem:[%s5863_s3 + $0x10] sm:$0xff] }
  0x4b   : > { %3267 = vmatmul.mubr.msk.f32.vlgmr.msra.gmra.mxu0 %vm620_vm0, %v592_v16  ;;  %3271 = vmatmul.mubr.msk.f32.vlgmr.msra.gmra.mxu1 %vm620_vm0, %v592_v16  ;;  %v595_v27 = vld [vmem:[%s5863_s3 + $0x18] sm:$0xff]  ;;  %v1750_v38 = vld [vmem:[%s5763_s7] sm:$0xff]  ;;  %v4168_v40 = vld [vmem:[%s5757_s1 + $0xf0] sm:$0xff]  ;;  %s3893_s3 = smov 1   ;;  %p3826_p11 = pnand %p3825_p5, %p5998_p10 }
  0x4c   : > { %703 = vmatprep.mubr.f32.mxu0 %v5775_v17  ;;  %792 = vmatprep.mubr.f32.mxu1 %v5775_v17  ;;  %v863_v32 = vld [vmem:[%s5761_s5 + $0x18] sm:$0xff]  ;;  %v3287_v39 = vld [vmem:[%s5763_s7 + $0x20] sm:$0xff]  ;;  %v4173_v41 = vld [vmem:[%s5757_s1 + $0x1f0] sm:$0xff] }
  0x4d   : > { %602 = vperm.xlu0 %3727, %v596_v18   ;;  %612 = vperm.xlu1 %3728, %v598_v19   ;;  %v867_v33 = vld [vmem:[%s5762_s6 + $0x18] sm:$0xff]  ;;  %v4178_v42 = vld [vmem:[%s5757_s1 + $0x70] sm:$0xff]  ;;  %v4188_v44 = vld [vmem:[%s5757_s1 + $0xe8] sm:$0xff]  ;;  %p3827_p12 = pneg %p3826_p11 }
  0x4e   : > { %v4138_v34 = vld [vmem:[%s5757_s1 + $0xf8] sm:$0xff]  ;;  %5866 = vst [vmem:[#allocation13_spill] sm:$0xff] %v4178_v42  ;;  %v4183_v43 = vld [vmem:[%s5757_s1 + $0x170] sm:$0xff]  ;;  %v4193_v45 = vld [vmem:[%s5757_s1 + $0x1e8] sm:$0xff] }
  0x4f   : > { %3268 = vmatmul.mubr.msk.f32.gmra.mxu0 %vm620_vm0, %v593_v20  ;;  %3272 = vmatmul.mubr.msk.f32.gmra.mxu1 %vm620_vm0, %v593_v20  ;;  %5864 = vst [vmem:[#allocation11_spill] sm:$0xff] %v4138_v34  ;;  %v4143_v35 = vld [vmem:[%s5757_s1 + $0x1f8] sm:$0xff]  ;;  %5867 = vst [vmem:[#allocation14_spill] sm:$0xff] %v4183_v43  ;;  %v3291_v46 = vld [vmem:[%s5763_s7 + $0x40] sm:$0xff] }
  0x50   : > { %709 = vmatprep.mubr.f32.mxu0 %v5775_v17  ;;  %798 = vmatprep.mubr.f32.mxu1 %v5775_v17  ;;  %5865 = vst [vmem:[#allocation12_spill] sm:$0xff] %v4143_v35  ;;  %v4148_v36 = vld [vmem:[%s5757_s1 + $0x78] sm:$0xff]  ;;  %5868 = vst [vmem:[#allocation15_spill] sm:$0xff] %v4193_v45  ;;  %v2058_v47 = vld [vmem:[%s5764_s8] sm:$0xff] }
  0x51   : > { %607 = vperm.xlu0 %3727, %v597_v22   ;;  %617 = vperm.xlu1 %3728, %v599_v23   ;;  %v4153_v37 = vld [vmem:[%s5757_s1 + $0x178] sm:$0xff]  ;;  %v4208_v48 = vld [vmem:[%s5757_s1 + $0x68] sm:$0xff]  ;;  %v4220_v50 = vld [vmem:[%s5757_s1 + $0xe0] sm:$0xff] }
  0x52   : > { %3318 = vmatprep.subr.mxu0 %v4138_v34  ;;  %3362 = vmatprep.subr.mxu1 %v4143_v35  ;;  %v4213_v49 = vld [vmem:[%s5757_s1 + $0x168] sm:$0xff]  ;;  %v4225_v51 = vld [vmem:[%s5757_s1 + $0x1e0] sm:$0xff]  ;;  %v4250_v56 = vld [vmem:[%s5757_s1 + $0xd8] sm:$0xff] }
  0x53   : > { %3269 = vmatmul.mubr.msk.f32.gmra.mxu0 %vm620_vm0, %v594_v24  ;;  %3273 = vmatmul.mubr.msk.f32.gmra.mxu1 %vm620_vm0, %v594_v24  ;;  %v4230_v52 = vld [vmem:[%s5757_s1 + $0x60] sm:$0xff]  ;;  %v1751_v54 = vld [vmem:[%s5763_s7 + $0x8] sm:$0xff]  ;;  %v4255_v57 = vld [vmem:[%s5757_s1 + $0x1d8] sm:$0xff] }
  0x54   : > { %715 = vmatprep.mubr.f32.mxu0 %v5775_v17  ;;  %804 = vmatprep.mubr.f32.mxu1 %v5775_v17  ;;  %v4235_v53 = vld [vmem:[%s5757_s1 + $0x160] sm:$0xff]  ;;  %v3288_v55 = vld [vmem:[%s5763_s7 + $0x28] sm:$0xff]  ;;  %v4262_v58 = vld [vmem:[%s5757_s1 + $0x58] sm:$0xff] }
  0x55   : > { %1627 = vperm.xlu0 %3727, %v860_v25   ;;  %1663 = vperm.xlu1 %3728, %v864_v26   ;;  %v4267_v59 = vld [vmem:[%s5757_s1 + $0x158] sm:$0xff]  ;;  %v4272_v60 = vld [vmem:[%s5757_s1 + $0xd0] sm:$0xff]  ;;  %v3292_v62 = vld [vmem:[%s5763_s7 + $0x48] sm:$0xff] }
  0x56   : > { %3319 = vmatpush3.msra.mxu0 %v4148_v36  ;;  %3363 = vmatpush3.msra.mxu1 %v4153_v37  ;;  %v4277_v61 = vld [vmem:[%s5757_s1 + $0x1d0] sm:$0xff]  ;;  %v4304_v2 = vld [vmem:[%s5757_s1 + $0xc8] sm:$0xff]  ;;  %v4334_v8 = vld [vmem:[%s5757_s1 + $0xc0] sm:$0xff] }
  0x57   : > { %3270 = vmatmul.mubr.msk.f32.gmra.mxu0 %vm620_vm0, %v595_v27  ;;  %3274 = vmatmul.mubr.msk.f32.gmra.mxu1 %vm620_vm0, %v595_v27  ;;  %v1752_v63 = vld [vmem:[%s5763_s7 + $0x10] sm:$0xff]  ;;  %v4309_v3 = vld [vmem:[%s5757_s1 + $0x1c8] sm:$0xff]  ;;  %v4339_v9 = vld [vmem:[%s5757_s1 + $0x1c0] sm:$0xff] }
  0x58   : > { %3320 = vmatprep.subr.mxu0 %v4168_v40  ;;  %3364 = vmatprep.subr.mxu1 %v4173_v41  ;;  %v4292_v0 = vld [vmem:[%s5757_s1 + $0x50] sm:$0xff]  ;;  %v4314_v4 = vld [vmem:[%s5757_s1 + $0x48] sm:$0xff]  ;;  %v4346_v10 = vld [vmem:[%s5757_s1 + $0x40] sm:$0xff] }
  0x59   : > { %1632 = vperm.xlu0 %3727, %v861_v28   ;;  %1668 = vperm.xlu1 %3728, %v865_v29   ;;  %v4297_v1 = vld [vmem:[%s5757_s1 + $0x150] sm:$0xff]  ;;  %v4319_v5 = vld [vmem:[%s5757_s1 + $0x148] sm:$0xff]  ;;  %v4351_v11 = vld [vmem:[%s5757_s1 + $0x140] sm:$0xff] }
  0x5a   : > { %3321 = vmatpush3.msra.mxu0 %v4178_v42  ;;  %3365 = vmatpush3.msra.mxu1 %v4183_v43  ;;  %v3289_v6 = vld [vmem:[%s5763_s7 + $0x30] sm:$0xff]  ;;  %v4356_v12 = vld [vmem:[%s5757_s1 + $0xb8] sm:$0xff]  ;;  %v2059_v14 = vld [vmem:[%s5764_s8 + $0x8] sm:$0xff] }
  0x5b   : > { %3322 = vmatprep.subr.mxu0 %v4188_v44  ;;  %3366 = vmatprep.subr.mxu1 %v4193_v45  ;;  %v3293_v7 = vld [vmem:[%s5763_s7 + $0x50] sm:$0xff]  ;;  %v4361_v13 = vld [vmem:[%s5757_s1 + $0x1b8] sm:$0xff]  ;;  %v4418_v25 = vld [vmem:[%s5757_s1 + $0xa8] sm:$0xff] }
  0x5c   : > { %3323 = vmatpush3.msra.mxu0 %v4208_v48  ;;  %3367 = vmatpush3.msra.mxu1 %v4213_v49  ;;  %v1753_v15 = vld [vmem:[%s5763_s7 + $0x18] sm:$0xff]  ;;  %v4388_v19 = vld [vmem:[%s5757_s1 + $0xb0] sm:$0xff]  ;;  %5870 = vst [vmem:[#allocation17_spill] sm:$0xff] %v4418_v25  ;;  %v4423_v26 = vld [vmem:[%s5757_s1 + $0x1a8] sm:$0xff] }
  0x5d   : > { %1637 = vperm.xlu0 %3727, %v862_v30   ;;  %1673 = vperm.xlu1 %3728, %v866_v31   ;;  %v4376_v16 = vld [vmem:[%s5757_s1 + $0x38] sm:$0xff]  ;;  %v4393_v20 = vld [vmem:[%s5757_s1 + $0x1b0] sm:$0xff]  ;;  %5871 = vst [vmem:[#allocation18_spill] sm:$0xff] %v4423_v26  ;;  %v4430_v27 = vld [vmem:[%s5757_s1 + $0x28] sm:$0xff] }
  0x5e   : > { %3324 = vmatprep.subr.mxu0 %v4220_v50  ;;  %3368 = vmatprep.subr.mxu1 %v4225_v51  ;;  %v4381_v18 = vld [vmem:[%s5757_s1 + $0x138] sm:$0xff]  ;;  %v4398_v21 = vld [vmem:[%s5757_s1 + $0x30] sm:$0xff]  ;;  %5872 = vst [vmem:[#allocation19_spill] sm:$0xff] %v4430_v27  ;;  %v4435_v28 = vld [vmem:[%s5757_s1 + $0x128] sm:$0xff] }
  0x5f   : > { %3325 = vmatpush3.msra.mxu0 %v4230_v52  ;;  %3369 = vmatpush3.msra.mxu1 %v4235_v53  ;;  %v4403_v22 = vld [vmem:[%s5757_s1 + $0x130] sm:$0xff]  ;;  %v3290_v23 = vld [vmem:[%s5763_s7 + $0x38] sm:$0xff]  ;;  %5873 = vst [vmem:[#allocation20_spill] sm:$0xff] %v4435_v28  ;;  %v4440_v29 = vld [vmem:[%s5757_s1 + $0xa0] sm:$0xff] }
  0x60   : > { %3326 = vmatprep.subr.mxu0 %v4250_v56  ;;  %3370 = vmatprep.subr.mxu1 %v4255_v57  ;;  %5869 = vst [vmem:[#allocation16_spill] sm:$0xff] %v4403_v22  ;;  %v3294_v24 = vld [vmem:[%s5763_s7 + $0x58] sm:$0xff]  ;;  %5874 = vst [vmem:[#allocation21_spill] sm:$0xff] %v4440_v29  ;;  %v4445_v30 = vld [vmem:[%s5757_s1 + $0x1a0] sm:$0xff] }
  0x61   : > { %1642 = vperm.xlu0 %3727, %v863_v32   ;;  %1678 = vperm.xlu1 %3728, %v867_v33   ;;  %5875 = vst [vmem:[#allocation22_spill] sm:$0xff] %v4445_v30  ;;  %v2060_v31 = vld [vmem:[%s5764_s8 + $0x10] sm:$0xff]  ;;  %v4455_v32 = vld [vmem:[%s5757_s1 + $0x20] sm:$0xff] }
  0x62   : > { %3327 = vmatpush3.msra.mxu0 %v4262_v58  ;;  %3371 = vmatpush3.msra.mxu1 %v4267_v59  ;;  %5876 = vst [vmem:[#allocation23_spill] sm:$0xff] %v4455_v32  ;;  %v4462_v33 = vld [vmem:[%s5757_s1 + $0x120] sm:$0xff] }
  0x63   : > { %3328 = vmatprep.subr.mxu0 %v4272_v60  ;;  %3372 = vmatprep.subr.mxu1 %v4277_v61  ;;  %5877 = vst [vmem:[#allocation24_spill] sm:$0xff] %v4462_v33  ;;  %v4560_v17 = vld [vmem:[%s5757_s1 + $0x100] sm:$0xff] }
  0x64   : > { %3329 = vmatpush3.msra.mxu0 %v4292_v0  ;;  %3373 = vmatpush3.msra.mxu1 %v4297_v1  ;;  %5893 = vst [vmem:[#allocation40_spill] sm:$0xff] %v4560_v17 }
  0x65   : > { %1809 = vperm.xlu0 %3727, %v1750_v38   ;;  %1882 = vperm.xlu1 %3728, %v3287_v39   ;;  %v4471_v38 = vld [vmem:[%s5757_s1 + $0x98] sm:$0xff] }
  0x66   : > { %3330 = vmatprep.subr.mxu0 %v4304_v2  ;;  %3374 = vmatprep.subr.mxu1 %v4309_v3  ;;  %5878 = vst [vmem:[#allocation25_spill] sm:$0xff] %v4471_v38  ;;  %v4476_v39 = vld [vmem:[%s5757_s1 + $0x198] sm:$0xff] }
  0x67   : > { %3331 = vmatpush3.msra.mxu0 %v4314_v4  ;;  %3375 = vmatpush3.msra.mxu1 %v4319_v5  ;;  %5879 = vst [vmem:[#allocation26_spill] sm:$0xff] %v4476_v39 }
  0x68   : > { %3332 = vmatprep.subr.mxu0 %v4334_v8  ;;  %3376 = vmatprep.subr.mxu1 %v4339_v9 }
  0x69   : > { %1992 = vperm.xlu0 %3727, %v3291_v46   ;;  %2064 = vperm.xlu1 %3728, %v2058_v47   ;;  %v4483_v46 = vld [vmem:[%s5757_s1 + $0x18] sm:$0xff] }
  0x6a   : > { %3333 = vmatpush3.msra.mxu0 %v4346_v10  ;;  %3377 = vmatpush3.msra.mxu1 %v4351_v11  ;;  %5880 = vst [vmem:[#allocation27_spill] sm:$0xff] %v4483_v46  ;;  %v4488_v47 = vld [vmem:[%s5757_s1 + $0x118] sm:$0xff] }
  0x6b   : > { %3334 = vmatprep.subr.mxu0 %v4356_v12  ;;  %3378 = vmatprep.subr.mxu1 %v4361_v13  ;;  %5881 = vst [vmem:[#allocation28_spill] sm:$0xff] %v4488_v47 }
  0x6c   : > { %3335 = vmatpush3.msra.mxu0 %v4376_v16  ;;  %3379 = vmatpush3.msra.mxu1 %v4381_v18 }
  0x6d   : > { %1814 = vperm.xlu0 %3727, %v1751_v54   ;;  %1887 = vperm.xlu1 %3728, %v3288_v55   ;;  %v4495_v54 = vld [vmem:[%s5757_s1 + $0x90] sm:$0xff] }
  0x6e   : > { %3336 = vmatprep.subr.mxu0 %v4388_v19  ;;  %3380 = vmatprep.subr.mxu1 %v4393_v20  ;;  %5882 = vst [vmem:[#allocation29_spill] sm:$0xff] %v4495_v54  ;;  %v4500_v55 = vld [vmem:[%s5757_s1 + $0x190] sm:$0xff] }
  0x6f   : > { %3337 = vmatpush3.msra.mxu0 %v4398_v21  ;;  %3381 = vmatpush3.msra.mxu1 %v4403_v22  ;;  %5883 = vst [vmem:[#allocation30_spill] sm:$0xff] %v4500_v55 }
  0x70   : > { %3338 = vmatprep.subr.mxu0 %v4418_v25  ;;  %3382 = vmatprep.subr.mxu1 %v4423_v26 }
  0x71   : > { %1997 = vperm.xlu0 %3727, %v3292_v62   ;;  %1819 = vperm.xlu1 %3728, %v1752_v63   ;;  %v4507_v62 = vld [vmem:[%s5757_s1 + $0x10] sm:$0xff] }
  0x72   : > { %3339 = vmatpush3.msra.mxu0 %v4430_v27  ;;  %3383 = vmatpush3.msra.mxu1 %v4435_v28  ;;  %5884 = vst [vmem:[#allocation31_spill] sm:$0xff] %v4507_v62  ;;  %v4512_v63 = vld [vmem:[%s5757_s1 + $0x110] sm:$0xff] }
  0x73   : > { %3340 = vmatprep.subr.mxu0 %v4440_v29  ;;  %3384 = vmatprep.subr.mxu1 %v4445_v30  ;;  %5885 = vst [vmem:[#allocation32_spill] sm:$0xff] %v4512_v63 }
  0x74   : > { %3341 = vmatpush3.msra.mxu0 %v4455_v32  ;;  %3385 = vmatpush3.msra.mxu1 %v4462_v33 }
  0x75   : > { %1892 = vperm.xlu0 %3727, %v3289_v6   ;;  %2002 = vperm.xlu1 %3728, %v3293_v7   ;;  %v4519_v6 = vld [vmem:[%s5757_s1 + $0x88] sm:$0xff] }
  0x76   : > { %3342 = vmatprep.subr.mxu0 %v4471_v38  ;;  %3386 = vmatprep.subr.mxu1 %v4476_v39  ;;  %5886 = vst [vmem:[#allocation33_spill] sm:$0xff] %v4519_v6  ;;  %v4524_v7 = vld [vmem:[%s5757_s1 + $0x188] sm:$0xff] }
  0x77   : > { %3343 = vmatpush3.msra.mxu0 %v4483_v46  ;;  %3387 = vmatpush3.msra.mxu1 %v4488_v47  ;;  %5887 = vst [vmem:[#allocation34_spill] sm:$0xff] %v4524_v7 }
  0x78   : > { %3344 = vmatprep.subr.mxu0 %v4495_v54  ;;  %3388 = vmatprep.subr.mxu1 %v4500_v55 }
  0x79   : > { %2069 = vperm.xlu0 %3727, %v2059_v14   ;;  %1824 = vperm.xlu1 %3728, %v1753_v15   ;;  %v4531_v14 = vld [vmem:[%s5757_s1 + $0x8] sm:$0xff] }
  0x7a   : > { %3345 = vmatpush3.msra.mxu0 %v4507_v62  ;;  %3389 = vmatpush3.msra.mxu1 %v4512_v63  ;;  %5888 = vst [vmem:[#allocation35_spill] sm:$0xff] %v4531_v14  ;;  %v4536_v15 = vld [vmem:[%s5757_s1 + $0x108] sm:$0xff] }
  0x7b   : > { %3346 = vmatprep.subr.mxu0 %v4519_v6  ;;  %3390 = vmatprep.subr.mxu1 %v4524_v7  ;;  %5889 = vst [vmem:[#allocation36_spill] sm:$0xff] %v4536_v15  ;;  %v4566_v7 = vstv %s590_s20  ;;  %s3894_s20 = smov 127  }
  0x7c   : > { %3347 = vmatpush3.msra.mxu0 %v4531_v14  ;;  %3391 = vmatpush3.msra.mxu1 %v4536_v15 }
  0x7d   : > { %1897 = vperm.xlu0 %3727, %v3290_v23   ;;  %2007 = vperm.xlu1 %3728, %v3294_v24   ;;  %v4543_v23 = vld [vmem:[%s5757_s1 + $0x80] sm:$0xff] }
  0x7e   : > { %5890 = vst [vmem:[#allocation37_spill] sm:$0xff] %v4543_v23  ;;  %v4548_v24 = vld [vmem:[%s5757_s1 + $0x180] sm:$0xff]  ;;  %3348 = vmatprep.subr.mxu0 %v4543_v23 }
  0x7f   : > { %5891 = vst [vmem:[#allocation38_spill] sm:$0xff] %v4548_v24  ;;  %3392 = vmatprep.subr.mxu1 %v4548_v24 }
  0x80   : > { %3393 = vmatpush3.msra.mxu1 %v4560_v17 }
  0x81   : > { %2074 = vperm.xlu0 %3727, %v2060_v31   ;;  %v4555_v31 = vld [vmem:[%s5757_s1] sm:$0xff]  ;;  %3450 = vmatprep.subr.mxu1 %v4143_v35 }
  0x82   : > { %5892 = vst [vmem:[#allocation39_spill] sm:$0xff] %v4555_v31  ;;  %3349 = vmatpush3.msra.mxu0 %v4555_v31 }
  0x83   : > { %3406 = vmatprep.subr.mxu0 %v4138_v34 }
  0xc8   : > { %v603_v24 = vpop.permute.xlu0 %602 }
  0xcc   : > { %v608_v46 = vpop.permute.xlu0 %607 }
 0x10b   : > { %v699_v23 = vpop.f32.mrf.mxu0  ;;  %v788_v15 = vpop.f32.mrf.mxu1 }
 0x10c   : > { %v700_v14 = vadd.f32 %v699_v23, %v603_v24  ;;  %v789_v62 = vadd.f32 %v788_v15, %v603_v24 }
 0x10d   : > { %v701_v6 = vpop.f32.mrf.mxu0  ;;  %v790_v63 = vpop.f32.mrf.mxu1 }
 0x10e   : > { %v702_v55 = vadd.f32 %v701_v6, %v603_v24  ;;  %v791_v54 = vadd.f32 %v790_v63, %v603_v24  ;;  %v828_v17 = vmul.f32 %v4566_v7, %v700_v14  ;;  %vm811_vm1 = vcmp.gt.f32.partialorder %v700_v14, 0.0  ;;  %v613_v24 = vpop.permute.xlu1 %612 }
 0x10f   : > { %v705_v47 = vpop.f32.mrf.mxu0  ;;  %v794_v31 = vpop.f32.mrf.mxu1  ;;  %v830_v23 = vmul.f32 %v4566_v7, %v789_v62  ;;  %vm813_vm2 = vcmp.gt.f32.partialorder %v789_v62, 0.0 }
 0x110   : > { %v829_v35 = vmul.f32 %v4566_v7, %v702_v55  ;;  %v831_v34 = vmul.f32 %v4566_v7, %v791_v54  ;;  %v706_v15 = vadd.f32 %v705_v47, %v608_v46  ;;  %vm812_vm3 = vcmp.gt.f32.partialorder %v702_v55, 0.0 }
 0x111   : > { %v707_v39 = vpop.f32.mrf.mxu0  ;;  %v796_v38 = vpop.f32.mrf.mxu1  ;;  %vm814_vm4 = vcmp.gt.f32.partialorder %v791_v54, 0.0  ;;  %v4572_v30 = vsel %vm811_vm1, %v700_v14, %v828_v17  ;;  %v795_v29 = vadd.f32 %v794_v31, %v608_v46  ;;  %v4581_v47 = vsel %vm813_vm2, %v789_v62, %v830_v23 }
 0x112   : > { %v708_v33 = vadd.f32 %v707_v39, %v608_v46  ;;  %v797_v32 = vadd.f32 %v796_v38, %v608_v46  ;;  %5894 = vst [vmem:[#allocation41_spill] sm:$0xff] %v4572_v30  ;;  %v4576_v26 = vsel %vm812_vm3, %v702_v55, %v829_v35  ;;  %v4578_v25 = vsel %vm814_vm4, %v791_v54, %v831_v34 }
 0x113   : > { %v711_v6 = vpop.f32.mrf.mxu0  ;;  %v800_v63 = vpop.f32.mrf.mxu1  ;;  %5895 = vst [vmem:[#allocation42_spill] sm:$0xff] %v4576_v26  ;;  %5896 = vst [vmem:[#allocation43_spill] sm:$0xff] %v4578_v25  ;;  %932 = vmatprep.mubr.f32.mxu0 %v4576_v26  ;;  %1017 = vmatprep.mubr.f32.mxu1 %v4578_v25  ;;  %v832_v46 = vmul.f32 %v4566_v7, %v706_v15  ;;  %v834_v55 = vmul.f32 %v4566_v7, %v795_v29  ;;  %vm815_vm7 = vcmp.gt.f32.partialorder %v706_v15, 0.0  ;;  %vm1265_vm1 = vcmask 1043456  }
 0x114   : > { %v833_v28 = vmul.f32 %v4566_v7, %v708_v33  ;;  %v835_v27 = vmul.f32 %v4566_v7, %v797_v32  ;;  %vm816_vm5 = vcmp.gt.f32.partialorder %v708_v33, 0.0  ;;  %vm818_vm6 = vcmp.gt.f32.partialorder %v797_v32, 0.0  ;;  %5897 = vst [vmem:[#allocation44_spill] sm:$0xff] %v4581_v47  ;;  %933 = vmatmul.mubr.f32.vlgmr.msra.gmra.mxu0 %v4572_v30  ;;  %1018 = vmatmul.mubr.f32.vlgmr.msra.gmra.mxu1 %v4581_v47 }
 0x115   : > { %v713_v39 = vpop.f32.mrf.mxu0  ;;  %v802_v38 = vpop.f32.mrf.mxu1  ;;  %v712_v22 = vadd.f32 %v711_v6, %v613_v24  ;;  %v801_v14 = vadd.f32 %v800_v63, %v613_v24  ;;  %3407 = vmatpush3.msra.mxu0 %v4148_v36  ;;  %3451 = vmatpush3.msra.mxu1 %v4153_v37  ;;  %vm817_vm8 = vcmp.gt.f32.partialorder %v795_v29, 0.0  ;;  %vm1038_vm2 = vcmask 31744  }
 0x116   : > { %v714_v17 = vadd.f32 %v713_v39, %v613_v24  ;;  %v803_v34 = vadd.f32 %v802_v38, %v613_v24  ;;  %v4592_v62 = vsel %vm816_vm5, %v708_v33, %v833_v28  ;;  %v4595_v31 = vsel %vm818_vm6, %v797_v32, %v835_v27  ;;  %3408 = vmatprep.subr.mxu0 %v4168_v40  ;;  %v618_v63 = vpop.permute.xlu1 %617 }
 0x117   : > { %v717_v35 = vpop.f32.mrf.mxu0  ;;  %v806_v54 = vpop.f32.mrf.mxu1  ;;  %5898 = vst [vmem:[#allocation45_spill] sm:$0xff] %v4592_v62  ;;  %5899 = vst [vmem:[#allocation46_spill] sm:$0xff] %v4595_v31  ;;  %3452 = vmatprep.subr.mxu1 %v4173_v41  ;;  %v836_v24 = vmul.f32 %v4566_v7, %v712_v22  ;;  %3409 = vmatpush3.msra.mxu0 %v4178_v42  ;;  %v838_v27 = vmul.f32 %v4566_v7, %v801_v14  ;;  %vm819_vm11 = vcmp.gt.f32.partialorder %v712_v22, 0.0 }
 0x118   : > { %v837_v39 = vmul.f32 %v4566_v7, %v714_v17  ;;  %v839_v38 = vmul.f32 %v4566_v7, %v803_v34  ;;  %3453 = vmatpush3.msra.mxu1 %v4183_v43  ;;  %937 = vmatprep.mubr.f32.mxu0 %v4592_v62  ;;  %vm820_vm9 = vcmp.gt.f32.partialorder %v714_v17, 0.0  ;;  %vm822_vm10 = vcmp.gt.f32.partialorder %v803_v34, 0.0 }
 0x119   : > { %v719_v23 = vpop.f32.mrf.mxu0  ;;  %v808_v6 = vpop.f32.mrf.mxu1  ;;  %1022 = vmatprep.mubr.f32.mxu1 %v4595_v31  ;;  %3410 = vmatprep.subr.mxu0 %v4188_v44  ;;  %v4610_v32 = vsel %vm815_vm7, %v706_v15, %v832_v46  ;;  %v4613_v33 = vsel %vm817_vm8, %v795_v29, %v834_v55  ;;  %v718_v42 = vadd.f32 %v717_v35, %v618_v63  ;;  %vm821_vm12 = vcmp.gt.f32.partialorder %v801_v14, 0.0 }
 0x11a   : > { %v720_v28 = vadd.f32 %v719_v23, %v618_v63  ;;  %3454 = vmatprep.subr.mxu1 %v4193_v45  ;;  %5900 = vst [vmem:[#allocation47_spill] sm:$0xff] %v4610_v32  ;;  %5901 = vst [vmem:[#allocation48_spill] sm:$0xff] %v4613_v33  ;;  %v809_v43 = vadd.f32 %v808_v6, %v618_v63  ;;  %938 = vmatmul.mubr.f32.gmra.mxu0 %v4610_v32  ;;  %v5910_v6 = vld [vmem:[#allocation16_spill] sm:$0xff] }
 0x11b   : > { %1023 = vmatmul.mubr.f32.gmra.mxu1 %v4613_v33  ;;  %v807_v23 = vadd.f32 %v806_v54, %v618_v63  ;;  %3411 = vmatpush3.msra.mxu0 %v4208_v48  ;;  %v4619_v45 = vsel %vm820_vm9, %v714_v17, %v837_v39  ;;  %v4621_v15 = vsel %vm822_vm10, %v803_v34, %v839_v38  ;;  %vm823_vm15 = vcmp.gt.f32.partialorder %v718_v42, 0.0  ;;  %v5911_v63 = vld [vmem:[#allocation17_spill] sm:$0xff]  ;;  %v5913_v39 = vld [vmem:[#allocation19_spill] sm:$0xff]  ;;  %v5914_v38 = vld [vmem:[#allocation20_spill] sm:$0xff] }
 0x11c   : > { %3455 = vmatpush3.msra.mxu1 %v4213_v49  ;;  %5902 = vst [vmem:[#allocation49_spill] sm:$0xff] %v4619_v45  ;;  %5903 = vst [vmem:[#allocation50_spill] sm:$0xff] %v4621_v15  ;;  %v841_v29 = vmul.f32 %v4566_v7, %v720_v28  ;;  %3412 = vmatprep.subr.mxu0 %v4220_v50  ;;  %v843_v46 = vmul.f32 %v4566_v7, %v809_v43  ;;  %vm824_vm13 = vcmp.gt.f32.partialorder %v720_v28, 0.0 }
 0x11d   : > { %3456 = vmatprep.subr.mxu1 %v4225_v51  ;;  %3413 = vmatpush3.msra.mxu0 %v4230_v52  ;;  %v4629_v35 = vsel %vm819_vm11, %v712_v22, %v836_v24  ;;  %v4631_v54 = vsel %vm821_vm12, %v801_v14, %v838_v27  ;;  %vm826_vm14 = vcmp.gt.f32.partialorder %v809_v43, 0.0  ;;  %v840_v17 = vmul.f32 %v4566_v7, %v718_v42  ;;  %v5912_v24 = vld [vmem:[#allocation18_spill] sm:$0xff]  ;;  %v5915_v27 = vld [vmem:[#allocation21_spill] sm:$0xff] }
 0x11e   : > { %3457 = vmatpush3.msra.mxu1 %v4235_v53  ;;  %5904 = vst [vmem:[#allocation51_spill] sm:$0xff] %v4629_v35  ;;  %5905 = vst [vmem:[#allocation52_spill] sm:$0xff] %v4631_v54  ;;  %942 = vmatprep.mubr.f32.mxu0 %v4619_v45  ;;  %v842_v34 = vmul.f32 %v4566_v7, %v807_v23  ;;  %vm825_vm0 = vcmp.gt.f32.partialorder %v807_v23, 0.0  ;;  %v4643_v22 = vsel %vm824_vm13, %v720_v28, %v841_v29  ;;  %v5916_v28 = vld [vmem:[#allocation22_spill] sm:$0xff]  ;;  %v5918_v29 = vld [vmem:[#allocation24_spill] sm:$0xff] }
 0x11f   : > { %1027 = vmatprep.mubr.f32.mxu1 %v4621_v15  ;;  %3414 = vmatprep.subr.mxu0 %v4250_v56  ;;  %5906 = vst [vmem:[#allocation53_spill] sm:$0xff] %v4643_v22  ;;  %v4645_v14 = vsel %vm826_vm14, %v809_v43, %v843_v46  ;;  %v4651_v7 = vsel %vm823_vm15, %v718_v42, %v840_v17  ;;  %v5919_v46 = vld [vmem:[#allocation25_spill] sm:$0xff]  ;;  %v5920_v17 = vld [vmem:[#allocation26_spill] sm:$0xff] }
 0x120   : > { %3458 = vmatprep.subr.mxu1 %v4255_v57  ;;  %943 = vmatmul.mubr.f32.gmra.mxu0 %v4629_v35  ;;  %5907 = vst [vmem:[#allocation54_spill] sm:$0xff] %v4645_v14  ;;  %5908 = vst [vmem:[#allocation55_spill] sm:$0xff] %v4651_v7  ;;  %v4653_v55 = vsel %vm825_vm0, %v807_v23, %v842_v34  ;;  %v1053_v43 = vmul.f32 %v4576_v26, %v4576_v26  ;;  %v5917_v23 = vld [vmem:[#allocation23_spill] sm:$0xff] }
 0x121   : > { %1028 = vmatmul.mubr.f32.gmra.mxu1 %v4631_v54  ;;  %3415 = vmatpush3.msra.mxu0 %v4262_v58  ;;  %5909 = vst [vmem:[#allocation56_spill] sm:$0xff] %v4653_v55  ;;  %v1055_v42 = vmul.f32 %v4578_v25, %v4578_v25  ;;  %v5921_v34 = vld [vmem:[#allocation27_spill] sm:$0xff]  ;;  %v5924_v25 = vld [vmem:[#allocation30_spill] sm:$0xff] }
 0x122   : > { %3459 = vmatpush3.msra.mxu1 %v4267_v59  ;;  %3416 = vmatprep.subr.mxu0 %v4272_v60  ;;  %v5925_v26 = vld [vmem:[#allocation31_spill] sm:$0xff] }
 0x123   : > { %3460 = vmatprep.subr.mxu1 %v4277_v61  ;;  %3417 = vmatpush3.msra.mxu0 %v4292_v0 }
 0x124   : > { %3461 = vmatpush3.msra.mxu1 %v4297_v1  ;;  %947 = vmatprep.mubr.f32.mxu0 %v4643_v22 }
 0x125   : > { %1032 = vmatprep.mubr.f32.mxu1 %v4645_v14  ;;  %3418 = vmatprep.subr.mxu0 %v4304_v2 }
 0x126   : > { %3462 = vmatprep.subr.mxu1 %v4309_v3  ;;  %948 = vmatmul.mubr.f32.gmra.mxu0 %v4651_v7 }
 0x127   : > { %1033 = vmatmul.mubr.f32.gmra.mxu1 %v4653_v55  ;;  %3419 = vmatpush3.msra.mxu0 %v4314_v4 }
 0x128   : > { %3463 = vmatpush3.msra.mxu1 %v4319_v5  ;;  %3420 = vmatprep.subr.mxu0 %v4334_v8 }
 0x129   : > { %1132 = vmatprep.mubr.f32.mxu0 %v1053_v43  ;;  %3464 = vmatprep.subr.mxu1 %v4339_v9  ;;  %v5922_v43 = vld [vmem:[#allocation28_spill] sm:$0xff] }
 0x12a   : > { %1217 = vmatprep.mubr.f32.mxu1 %v1055_v42  ;;  %3421 = vmatpush3.msra.mxu0 %v4346_v10  ;;  %v5923_v42 = vld [vmem:[#allocation29_spill] sm:$0xff] }
 0x12b   : > { %3465 = vmatpush3.msra.mxu1 %v4351_v11  ;;  %3422 = vmatprep.subr.mxu0 %v4356_v12 }
 0x12c   : > { %3466 = vmatprep.subr.mxu1 %v4361_v13  ;;  %3423 = vmatpush3.msra.mxu0 %v4376_v16 }
 0x12d   : > { %3467 = vmatpush3.msra.mxu1 %v4381_v18  ;;  %3424 = vmatprep.subr.mxu0 %v4388_v19 }
 0x12e   : > { %3468 = vmatprep.subr.mxu1 %v4393_v20  ;;  %3425 = vmatpush3.msra.mxu0 %v4398_v21 }
 0x12f   : > { %3469 = vmatpush3.msra.mxu1 %v5910_v6  ;;  %3426 = vmatprep.subr.mxu0 %v5911_v63 }
 0x130   : > { %3470 = vmatprep.subr.mxu1 %v5912_v24  ;;  %3427 = vmatpush3.msra.mxu0 %v5913_v39 }
 0x131   : > { %3471 = vmatpush3.msra.mxu1 %v5914_v38  ;;  %3428 = vmatprep.subr.mxu0 %v5915_v27  ;;  %v5926_v27 = vld [vmem:[#allocation32_spill] sm:$0xff] }
 0x132   : > { %3472 = vmatprep.subr.mxu1 %v5916_v28  ;;  %3429 = vmatpush3.msra.mxu0 %v5917_v23  ;;  %v5927_v28 = vld [vmem:[#allocation33_spill] sm:$0xff]  ;;  %v5928_v23 = vld [vmem:[#allocation34_spill] sm:$0xff] }
 0x133   : > { %3473 = vmatpush3.msra.mxu1 %v5918_v29  ;;  %3430 = vmatprep.subr.mxu0 %v5919_v46  ;;  %v5929_v29 = vld [vmem:[#allocation35_spill] sm:$0xff]  ;;  %v5930_v46 = vld [vmem:[#allocation36_spill] sm:$0xff] }
 0x134   : > { %3474 = vmatprep.subr.mxu1 %v5920_v17  ;;  %3431 = vmatpush3.msra.mxu0 %v5921_v34  ;;  %v1052_v34 = vmul.f32 %v4572_v30, %v4572_v30  ;;  %v1058_v30 = vmul.f32 %v4613_v33, %v4613_v33 }
 0x135   : > { %3475 = vmatpush3.msra.mxu1 %v5922_v43  ;;  %3432 = vmatprep.subr.mxu0 %v5923_v42  ;;  %v1054_v42 = vmul.f32 %v4581_v47, %v4581_v47  ;;  %v5931_v43 = vld [vmem:[#allocation37_spill] sm:$0xff]  ;;  %v1056_v47 = vmul.f32 %v4610_v32, %v4610_v32 }
 0x136   : > { %3476 = vmatprep.subr.mxu1 %v5924_v25  ;;  %3433 = vmatpush3.msra.mxu0 %v5925_v26  ;;  %v5932_v25 = vld [vmem:[#allocation38_spill] sm:$0xff]  ;;  %v5933_v26 = vld [vmem:[#allocation39_spill] sm:$0xff] }
 0x137   : > { %3477 = vmatpush3.msra.mxu1 %v5926_v27  ;;  %3434 = vmatprep.subr.mxu0 %v5927_v28  ;;  %v5934_v27 = vld [vmem:[#allocation40_spill] sm:$0xff] }
 0x138   : > { %3478 = vmatprep.subr.mxu1 %v5928_v23  ;;  %3435 = vmatpush3.msra.mxu0 %v5929_v29  ;;  %v1057_v23 = vmul.f32 %v4592_v62, %v4592_v62 }
 0x139   : > { %3479 = vmatpush3.msra.mxu1 %v5930_v46  ;;  %3436 = vmatprep.subr.mxu0 %v5931_v43  ;;  %v1059_v46 = vmul.f32 %v4595_v31, %v4595_v31 }
 0x13a   : > { %3480 = vmatprep.subr.mxu1 %v5932_v25  ;;  %3437 = vmatpush3.msra.mxu0 %v5933_v26  ;;  %v1061_v26 = vmul.f32 %v4619_v45, %v4619_v45 }
 0x13b   : > { %3481 = vmatpush3.msra.mxu1 %v5934_v27  ;;  %1133 = vmatmul.mubr.f32.vlgmr.msra.gmra.mxu0 %v1052_v34  ;;  %v1063_v27 = vmul.f32 %v4621_v15, %v4621_v15  ;;  %v1065_v34 = vmul.f32 %v4643_v22, %v4643_v22 }
 0x13c   : > { %1218 = vmatmul.mubr.f32.vlgmr.msra.gmra.mxu1 %v1054_v42  ;;  %1137 = vmatprep.mubr.f32.mxu0 %v1057_v23  ;;  %v1060_v23 = vmul.f32 %v4629_v35, %v4629_v35  ;;  %v1067_v42 = vmul.f32 %v4645_v14, %v4645_v14 }
 0x13d   : > { %1222 = vmatprep.mubr.f32.mxu1 %v1059_v46  ;;  %v1062_v46 = vmul.f32 %v4631_v54, %v4631_v54 }
 0x13f   : > { %1138 = vmatmul.mubr.f32.gmra.mxu0 %v1056_v47  ;;  %v5935_v47 = vmov 0.0  }
 0x140   : > { %1223 = vmatmul.mubr.f32.gmra.mxu1 %v1058_v30  ;;  %1142 = vmatprep.mubr.f32.mxu0 %v1061_v26  ;;  %v1064_v26 = vmul.f32 %v4651_v7, %v4651_v7  ;;  %v1066_v30 = vmul.f32 %v4653_v55, %v4653_v55 }
 0x141   : > { %1227 = vmatprep.mubr.f32.mxu1 %v1063_v27  ;;  %v588_v27 = vld [vmem:[%s5758_s2] sm:$0xff] }
 0x143   : > { %1143 = vmatmul.mubr.f32.gmra.mxu0 %v1060_v23  ;;  %v4739_v23 = vld [vmem:[%s5758_s2 + $0x8] sm:$0xff] }
 0x144   : > { %1228 = vmatmul.mubr.f32.gmra.mxu1 %v1062_v46  ;;  %1147 = vmatprep.mubr.f32.mxu0 %v1065_v34  ;;  %v4741_v46 = vcombine.high %v588_v27, %v588_v27  ;;  %v4745_v34 = vcombine.high %v4739_v23, %v4739_v23 }
 0x145   : > { %1232 = vmatprep.mubr.f32.mxu1 %v1067_v42 }
 0x146   : > { %5936 = vst [vmem:[#allocation16_spill] sm:$0xff] %v4741_v46  ;;  %5937 = vst [vmem:[#allocation57_spill] sm:$0xff] %v4745_v34  ;;  %3275 = vmatprep.subr.msk.mxu0 %vm1265_vm1, %v4741_v46  ;;  %3278 = vmatprep.subr.msk.mxu1 %vm1265_vm1, %v4745_v34 }
 0x147   : > { %1148 = vmatmul.mubr.f32.gmra.mxu0 %v1064_v26  ;;  %3279 = vmatpush1.msk.msra.mxu1 %vm1265_vm1, %v4739_v23 }
 0x148   : > { %1233 = vmatmul.mubr.f32.gmra.mxu1 %v1066_v30  ;;  %1338 = vmatprep.mubr.f32.mxu0 %v5935_v47 }
 0x149   : > { %1409 = vmatprep.mubr.f32.mxu1 %v5935_v47  ;;  %3276 = vmatpush1.msk.msra.mxu0 %vm1265_vm1, %v588_v27 }
 0x14a   : > { %3281 = vmatprep.subr.msk.mxu0 %vm1265_vm1, %v4741_v46  ;;  %3284 = vmatprep.subr.msk.mxu1 %vm1265_vm1, %v4745_v34 }
 0x1d4   : > { %v3350_v42 = vpop.f32.mrf.mxu0  ;;  %v3394_v26 = vpop.f32.mrf.mxu1 }
 0x1d6   : > { %v3351_v30 = vpop.f32.mrf.mxu0  ;;  %v3395_v14 = vpop.f32.mrf.mxu1 }
 0x1d7   : > { %v3352_v33 = vadd.f32 %v3351_v30, %v3350_v42  ;;  %v3396_v62 = vadd.f32 %v3395_v14, %v3394_v26 }
 0x1d9   : > { %v1020_v34 = vadd.f32 %v3396_v62, %v3352_v33 }
 0x1da   : > { %v3353_v55 = vpop.f32.mrf.mxu0 }
 0x1db   : > { %v3397_v22 = vpop.f32.mrf.mxu1 }
 0x1dc   : > { %v3354_v7 = vpop.f32.mrf.mxu0 }
 0x1dd   : > { %v3398_v15 = vpop.f32.mrf.mxu1  ;;  %v3355_v54 = vadd.f32 %v3354_v7, %v3353_v55 }
 0x1de   : > { %v3399_v45 = vadd.f32 %v3398_v15, %v3397_v22  ;;  %v1039_v15 = vsel %vm1038_vm2, %v1020_v34, 0.0 }
 0x1e0   : > { %v3356_v35 = vpop.f32.mrf.mxu0  ;;  %v1025_v46 = vadd.f32 %v3399_v45, %v3355_v54 }
 0x1e1   : > { %v3400_v31 = vpop.f32.mrf.mxu1 }
 0x1e2   : > { %v3357_v32 = vpop.f32.mrf.mxu0  ;;  %v1040_v39 = vsel %vm1038_vm2, %v1025_v46, 0.0 }
 0x1e3   : > { %v3401_v25 = vpop.f32.mrf.mxu1  ;;  %v3358_v43 = vadd.f32 %v3357_v32, %v3356_v35  ;;  %v1041_v55 = vadd.f32 %v1040_v39, %v1039_v15 }
 0x1e4   : > { %v3402_v29 = vadd.f32 %v3401_v25, %v3400_v31 }
 0x1e6   : > { %v1030_v28 = vadd.f32 %v3402_v29, %v3358_v43  ;;  %v3359_v17 = vpop.f32.mrf.mxu0 }
 0x1e7   : > { %v3403_v38 = vpop.f32.mrf.mxu1 }
 0x1e8   : > { %v3360_v24 = vpop.f32.mrf.mxu0  ;;  %v1042_v22 = vsel %vm1038_vm2, %v1030_v28, 0.0  ;;  %v5938_v28 = vld [vmem:[#allocation11_spill] sm:$0xff] }
 0x1e9   : > { %v3404_v63 = vpop.f32.mrf.mxu1  ;;  %v3361_v7 = vadd.f32 %v3360_v24, %v3359_v17  ;;  %v1043_v45 = vadd.f32 %v1042_v22, %v1041_v55  ;;  %v5939_v17 = vld [vmem:[#allocation12_spill] sm:$0xff] }
 0x1ea   : > { %v3405_v14 = vadd.f32 %v3404_v63, %v3403_v38 }
 0x1ec   : > { %v1035_v42 = vadd.f32 %v3405_v14, %v3361_v7 }
 0x1ee   : > { %v1044_v25 = vsel %vm1038_vm2, %v1035_v42, 0.0 }
 0x1ef   : > { %v1045_v62 = vadd.f32 %v1044_v25, %v1043_v45 }
 0x1f1   : > { %v1046_v31 = vrot.slane %v1045_v62, 4 }
 0x1f3   : > { %v1047_v32 = vadd.f32 %v1046_v31, %v1045_v62 }
 0x1f5   : > { %v1048_v33 = vrot.slane %v1047_v32, 2 }
 0x1f7   : > { %v1049_v35 = vadd.f32 %v1048_v33, %v1047_v32 }
 0x1f9   : > { %v1050_v54 = vrot.slane %v1049_v35, 1 }
 0x1fb   : > { %v1051_v29 = vadd.f32 %v1050_v54, %v1049_v35  ;;  %v3438_v43 = vpop.f32.mrf.mxu0 }
 0x1fc   : > { %v3482_v46 = vpop.f32.mrf.mxu1 }
 0x1fd   : > { %v1251_v26 = vmul.f32 0.00024414063, %v1051_v29  ;;  %v3439_v34 = vpop.f32.mrf.mxu0 }
 0x1fe   : > { %v3483_v30 = vpop.f32.mrf.mxu1  ;;  %v3440_v15 = vadd.f32 %v3439_v34, %v3438_v43 }
 0x1ff   : > { %3277 = vmatmul.mubr.msk.f32.vlgmr.msra.gmra.mxu0 %vm1038_vm2, %v1251_v26  ;;  %3280 = vmatmul.mubr.msk.f32.vlgmr.msra.gmra.mxu1 %vm1038_vm2, %v1251_v26  ;;  %v3441_v63 = vpop.f32.mrf.mxu0  ;;  %v3484_v22 = vadd.f32 %v3483_v30, %v3482_v46 }
 0x200   : > { %v3485_v24 = vpop.f32.mrf.mxu1  ;;  %3282 = vmatpush1.msk.msra.mxu0 %vm1265_vm1, %v588_v27  ;;  %1483 = vmatprep.mubr.f32.mxu0 %v5935_v47 }
 0x201   : > { %3285 = vmatpush1.msk.msra.mxu1 %vm1265_vm1, %v4739_v23  ;;  %1554 = vmatprep.mubr.f32.mxu1 %v5935_v47  ;;  %v3442_v39 = vpop.f32.mrf.mxu0  ;;  %v1220_v62 = vadd.f32 %v3484_v22, %v3440_v15 }
 0x202   : > { %v3486_v38 = vpop.f32.mrf.mxu1  ;;  %3494 = vmatprep.subr.mxu0 %v5938_v28  ;;  %3538 = vmatprep.subr.mxu1 %v5939_v17  ;;  %v3443_v7 = vadd.f32 %v3442_v39, %v3441_v63 }
 0x203   : > { %v3487_v14 = vadd.f32 %v3486_v38, %v3485_v24  ;;  %v3444_v55 = vpop.f32.mrf.mxu0  ;;  %v1238_v43 = vsel %vm1038_vm2, %v1220_v62, 0.0 }
 0x204   : > { %v3488_v42 = vpop.f32.mrf.mxu1 }
 0x205   : > { %v1225_v27 = vadd.f32 %v3487_v14, %v3443_v7  ;;  %v3445_v45 = vpop.f32.mrf.mxu0 }
 0x206   : > { %v3489_v25 = vpop.f32.mrf.mxu1  ;;  %v3446_v31 = vadd.f32 %v3445_v45, %v3444_v55  ;;  %v1253_v45 = vmul.f32 %v1251_v26, %v1251_v26  ;;  %v5941_v26 = vld [vmem:[#allocation14_spill] sm:$0xff] }
 0x207   : > { %v3490_v23 = vadd.f32 %v3489_v25, %v3488_v42  ;;  %v3447_v32 = vpop.f32.mrf.mxu0  ;;  %v1239_v35 = vsel %vm1038_vm2, %v1225_v27, 0.0 }
 0x208   : > { %v3491_v33 = vpop.f32.mrf.mxu1  ;;  %v1240_v63 = vadd.f32 %v1239_v35, %v1238_v43  ;;  %v5967_v43 = vld [vmem:[#allocation41_spill] sm:$0xff] }
 0x209   : > { %v1230_v54 = vadd.f32 %v3490_v23, %v3446_v31  ;;  %v3448_v29 = vpop.f32.mrf.mxu0 }
 0x20a   : > { %v3492_v28 = vpop.f32.mrf.mxu1  ;;  %v3449_v34 = vadd.f32 %v3448_v29, %v3447_v32  ;;  %v5940_v32 = vld [vmem:[#allocation13_spill] sm:$0xff] }
 0x20b   : > { %v1241_v46 = vsel %vm1038_vm2, %v1230_v54, 0.0  ;;  %v3493_v30 = vadd.f32 %v3492_v28, %v3491_v33  ;;  %v5942_v33 = vld [vmem:[#allocation15_spill] sm:$0xff] }
 0x20c   : > { %v1242_v39 = vadd.f32 %v1241_v46, %v1240_v63 }
 0x20d   : > { %v1235_v24 = vadd.f32 %v3493_v30, %v3449_v34  ;;  %v5968_v34 = vld [vmem:[#allocation44_spill] sm:$0xff] }
 0x20f   : > { %v1243_v38 = vsel %vm1038_vm2, %v1235_v24, 0.0 }
 0x210   : > { %v1244_v17 = vadd.f32 %v1243_v38, %v1242_v39  ;;  %v5969_v39 = vld [vmem:[#allocation42_spill] sm:$0xff] }
 0x212   : > { %v1245_v15 = vrot.slane %v1244_v17, 4 }
 0x214   : > { %v1246_v22 = vadd.f32 %v1245_v15, %v1244_v17  ;;  %v5970_v17 = vld [vmem:[#allocation43_spill] sm:$0xff] }
 0x216   : > { %v1247_v7 = vrot.slane %v1246_v22, 2 }
 0x218   : > { %v1248_v14 = vadd.f32 %v1247_v7, %v1246_v22 }
 0x21a   : > { %v1249_v55 = vrot.slane %v1248_v14, 1 }
 0x21c   : > { %v1250_v42 = vadd.f32 %v1249_v55, %v1248_v14 }
 0x21e   : > { %v1252_v27 = vmul.f32 0.00024414063, %v1250_v42 }
 0x220   : > { %v1254_v25 = vsub.f32 %v1252_v27, %v1253_v45  ;;  %v1628_v45 = vpop.permute.xlu0 %1627 }
 0x222   : > { %v1255_v62 = vmax.f32 %v1254_v25, 0.0 }
 0x224   : > { %v1256_v31 = vadd.f32 1e-05, %v1255_v62 }
 0x226   : > { %3731 = vrsqrt.f32 %v1256_v31 }
 0x233   : > { %v3732_v23 = vpop.eup %3731 }
 0x234   : > { %3283 = vmatmul.mubr.msk.f32.vlgmr.msra.gmra.mxu0 %vm1038_vm2, %v3732_v23  ;;  %3286 = vmatmul.mubr.msk.f32.vlgmr.msra.gmra.mxu1 %vm1038_vm2, %v3732_v23  ;;  %v1664_v23 = vpop.permute.xlu1 %1663 }
 0x235   : > { %3495 = vmatpush3.msra.mxu0 %v4148_v36  ;;  %3539 = vmatpush3.msra.mxu1 %v4153_v37  ;;  %v5943_v36 = vld [vmem:[#allocation17_spill] sm:$0xff]  ;;  %v5944_v37 = vld [vmem:[#allocation18_spill] sm:$0xff] }
 0x236   : > { %3496 = vmatprep.subr.mxu0 %v4168_v40  ;;  %3540 = vmatprep.subr.mxu1 %v4173_v41  ;;  %v5945_v40 = vld [vmem:[#allocation19_spill] sm:$0xff]  ;;  %v5946_v41 = vld [vmem:[#allocation20_spill] sm:$0xff] }
 0x237   : > { %3497 = vmatpush3.msra.mxu0 %v5940_v32  ;;  %3541 = vmatpush3.msra.mxu1 %v5941_v26 }
 0x238   : > { %3498 = vmatprep.subr.mxu0 %v4188_v44  ;;  %3542 = vmatprep.subr.mxu1 %v5942_v33  ;;  %v5947_v44 = vld [vmem:[#allocation21_spill] sm:$0xff] }
 0x239   : > { %3499 = vmatpush3.msra.mxu0 %v4208_v48  ;;  %3543 = vmatpush3.msra.mxu1 %v4213_v49  ;;  %v5948_v48 = vld [vmem:[#allocation22_spill] sm:$0xff]  ;;  %v5949_v49 = vld [vmem:[#allocation23_spill] sm:$0xff] }
 0x23a   : > { %3500 = vmatprep.subr.mxu0 %v4220_v50  ;;  %3544 = vmatprep.subr.mxu1 %v4225_v51  ;;  %v5950_v50 = vld [vmem:[#allocation24_spill] sm:$0xff]  ;;  %v5951_v51 = vld [vmem:[#allocation25_spill] sm:$0xff] }
 0x23b   : > { %3501 = vmatpush3.msra.mxu0 %v4230_v52  ;;  %3545 = vmatpush3.msra.mxu1 %v4235_v53  ;;  %v5952_v52 = vld [vmem:[#allocation26_spill] sm:$0xff]  ;;  %v5953_v53 = vld [vmem:[#allocation27_spill] sm:$0xff] }
 0x23c   : > { %3502 = vmatprep.subr.mxu0 %v4250_v56  ;;  %3546 = vmatprep.subr.mxu1 %v4255_v57  ;;  %v5954_v56 = vld [vmem:[#allocation28_spill] sm:$0xff]  ;;  %v5955_v57 = vld [vmem:[#allocation29_spill] sm:$0xff] }
 0x23d   : > { %3503 = vmatpush3.msra.mxu0 %v4262_v58  ;;  %3547 = vmatpush3.msra.mxu1 %v4267_v59  ;;  %v5956_v58 = vld [vmem:[#allocation30_spill] sm:$0xff]  ;;  %v5957_v59 = vld [vmem:[#allocation31_spill] sm:$0xff] }
 0x23e   : > { %3504 = vmatprep.subr.mxu0 %v4272_v60  ;;  %3548 = vmatprep.subr.mxu1 %v4277_v61  ;;  %v5958_v60 = vld [vmem:[#allocation32_spill] sm:$0xff]  ;;  %v5959_v61 = vld [vmem:[#allocation33_spill] sm:$0xff] }
 0x23f   : > { %3505 = vmatpush3.msra.mxu0 %v4292_v0  ;;  %3549 = vmatpush3.msra.mxu1 %v4297_v1  ;;  %v5960_v0 = vld [vmem:[#allocation34_spill] sm:$0xff]  ;;  %v5961_v1 = vld [vmem:[#allocation35_spill] sm:$0xff] }
 0x240   : > { %3506 = vmatprep.subr.mxu0 %v4304_v2  ;;  %3550 = vmatprep.subr.mxu1 %v4309_v3  ;;  %v5962_v2 = vld [vmem:[#allocation36_spill] sm:$0xff]  ;;  %v5963_v3 = vld [vmem:[#allocation37_spill] sm:$0xff] }
 0x241   : > { %3507 = vmatpush3.msra.mxu0 %v4314_v4  ;;  %3551 = vmatpush3.msra.mxu1 %v4319_v5  ;;  %v5964_v4 = vld [vmem:[#allocation38_spill] sm:$0xff]  ;;  %v5965_v5 = vld [vmem:[#allocation39_spill] sm:$0xff] }
 0x242   : > { %3508 = vmatprep.subr.mxu0 %v4334_v8  ;;  %3552 = vmatprep.subr.mxu1 %v4339_v9  ;;  %v5966_v8 = vld [vmem:[#allocation40_spill] sm:$0xff]  ;;  %v3735_v9 = vld [vmem:[%s5757_s1 + $0xf8] sm:$0xff] }
 0x243   : > { %3509 = vmatpush3.msra.mxu0 %v4346_v10  ;;  %3553 = vmatpush3.msra.mxu1 %v4351_v11  ;;  %v3736_v10 = vld [vmem:[%s5757_s1 + $0x1f8] sm:$0xff]  ;;  %v1561_v11 = vlaneseq }
 0x244   : > { %3510 = vmatprep.subr.mxu0 %v4356_v12  ;;  %3554 = vmatprep.subr.mxu1 %v4361_v13 }
 0x245   : > { %3511 = vmatpush3.msra.mxu0 %v4376_v16  ;;  %3555 = vmatpush3.msra.mxu1 %v4381_v18  ;;  %v1562_v12 = vshrl.u32 %v1561_v11, 7 }
 0x246   : > { %3512 = vmatprep.subr.mxu0 %v4388_v19  ;;  %3556 = vmatprep.subr.mxu1 %v4393_v20 }
 0x247   : > { %3513 = vmatpush3.msra.mxu0 %v4398_v21  ;;  %3557 = vmatpush3.msra.mxu1 %v5910_v6  ;;  %v4846_v18 = vsub.s32 0, %v1562_v12 }
 0x248   : > { %3514 = vmatprep.subr.mxu0 %v5943_v36  ;;  %3558 = vmatprep.subr.mxu1 %v5944_v37 }
 0x249   : > { %3515 = vmatpush3.msra.mxu0 %v5945_v40  ;;  %3559 = vmatpush3.msra.mxu1 %v5946_v41  ;;  %v5971_v41 = vld [vmem:[#allocation47_spill] sm:$0xff] }
 0x24a   : > { %3516 = vmatprep.subr.mxu0 %v5947_v44  ;;  %3560 = vmatprep.subr.mxu1 %v5948_v48 }
 0x24b   : > { %3517 = vmatpush3.msra.mxu0 %v5949_v49  ;;  %3561 = vmatpush3.msra.mxu1 %v5950_v50  ;;  %v5972_v49 = vld [vmem:[#allocation45_spill] sm:$0xff] }
 0x24c   : > { %3518 = vmatprep.subr.mxu0 %v5951_v51  ;;  %3562 = vmatprep.subr.mxu1 %v5952_v52  ;;  %v5973_v52 = vld [vmem:[#allocation48_spill] sm:$0xff] }
 0x24d   : > { %3519 = vmatpush3.msra.mxu0 %v5953_v53  ;;  %3563 = vmatpush3.msra.mxu1 %v5954_v56 }
 0x24e   : > { %3520 = vmatprep.subr.mxu0 %v5955_v57  ;;  %3564 = vmatprep.subr.mxu1 %v5956_v58  ;;  %v1633_v57 = vpop.permute.xlu0 %1632  ;;  %v5974_v58 = vld [vmem:[#allocation46_spill] sm:$0xff] }
 0x24f   : > { %3521 = vmatpush3.msra.mxu0 %v5957_v59  ;;  %3565 = vmatpush3.msra.mxu1 %v5958_v60 }
 0x250   : > { %3522 = vmatprep.subr.mxu0 %v5959_v61  ;;  %3566 = vmatprep.subr.mxu1 %v5960_v0 }
 0x251   : > { %3523 = vmatpush3.msra.mxu0 %v5961_v1  ;;  %3567 = vmatpush3.msra.mxu1 %v5962_v2  ;;  %v1669_v2 = vpop.permute.xlu1 %1668 }
 0x252   : > { %3524 = vmatprep.subr.mxu0 %v5963_v3  ;;  %3568 = vmatprep.subr.mxu1 %v5964_v4 }
 0x253   : > { %3525 = vmatpush3.msra.mxu0 %v5965_v5  ;;  %3569 = vmatpush3.msra.mxu1 %v5966_v8 }
 0x254   : > { %3582 = vmatprep.subr.mxu0 %v3735_v9  ;;  %3626 = vmatprep.subr.mxu1 %v3736_v10  ;;  %v5975_v10 = vld [vmem:[#allocation51_spill] sm:$0xff] }
 0x2bf   : > { %v1340_v13 = vpop.f32.mrf.mxu0  ;;  %v1411_v16 = vpop.f32.mrf.mxu1 }
 0x2c0   : > { %v4849_v21 = vrot.slane %v1340_v13, %v4846_v18  ;;  %v4852_v6 = vrot.slane %v1411_v16, %v4846_v18  ;;  %v5976_v16 = vld [vmem:[#allocation49_spill] sm:$0xff] }
 0x2c1   : > { %v1342_v19 = vpop.f32.mrf.mxu0  ;;  %v1413_v20 = vpop.f32.mrf.mxu1 }
 0x2c2   : > { %v4855_v35 = vrot.slane %v1342_v19, %v4846_v18  ;;  %v4858_v54 = vrot.slane %v1413_v20, %v4846_v18  ;;  %v1577_v46 = vsub.f32 %v5967_v43, %v4849_v21  ;;  %v1579_v30 = vsub.f32 %v5968_v34, %v4852_v6  ;;  %v5978_v34 = vld [vmem:[#allocation50_spill] sm:$0xff] }
 0x2c3   : > { %v1581_v44 = vsub.f32 %v5971_v41, %v4849_v21  ;;  %v1583_v53 = vsub.f32 %v5973_v52, %v4852_v6  ;;  %v1585_v12 = vsub.f32 %v5975_v10, %v4849_v21  ;;  %v5981_v41 = vld [vmem:[#allocation56_spill] sm:$0xff] }
 0x2c4   : > { %v1578_v38 = vsub.f32 %v5969_v39, %v4855_v35  ;;  %v1580_v15 = vsub.f32 %v5970_v17, %v4858_v54  ;;  %v1582_v50 = vsub.f32 %v5972_v49, %v4855_v35  ;;  %v1584_v59 = vsub.f32 %v5974_v58, %v4858_v54  ;;  %v2061_v58 = vld [vmem:[%s5764_s8 + $0x18] sm:$0xff]  ;;  %v2152_v10 = vld [vmem:[%s5766_s10 + $0x8] sm:$0xff] }
 0x2c5   : > { %v1586_v19 = vsub.f32 %v5976_v16, %v4855_v35  ;;  %v2151_v16 = vld [vmem:[%s5766_s10] sm:$0xff] }
 0x2f4   : > { %v1485_v29 = vpop.f32.mrf.mxu0  ;;  %v1556_v28 = vpop.f32.mrf.mxu1 }
 0x2f5   : > { %v4865_v63 = vrot.slane %v1485_v29, %v4846_v18  ;;  %v4868_v24 = vrot.slane %v1556_v28, %v4846_v18  ;;  %v5977_v29 = vld [vmem:[#allocation52_spill] sm:$0xff] }
 0x2f6   : > { %v1487_v22 = vpop.f32.mrf.mxu0  ;;  %v1558_v7 = vpop.f32.mrf.mxu1  ;;  %v1587_v28 = vsub.f32 %v5977_v29, %v4852_v6  ;;  %v2973_v29 = vld [vmem:[%s5768_s12 + $0x8] sm:$0xff] }
 0x2f7   : > { %v4875_v14 = vrot.slane %v1487_v22, %v4846_v18  ;;  %v4878_v55 = vrot.slane %v1558_v7, %v4846_v18  ;;  %v1609_v42 = vmul.f32 %v4865_v63, %v1577_v46  ;;  %v1611_v27 = vmul.f32 %v4868_v24, %v1579_v30  ;;  %v1638_v46 = vpop.permute.xlu0 %1637  ;;  %v1674_v22 = vpop.permute.xlu1 %1673 }
 0x2f8   : > { %v1613_v51 = vmul.f32 %v4865_v63, %v1581_v44  ;;  %v1615_v61 = vmul.f32 %v4868_v24, %v1583_v53  ;;  %v1617_v20 = vmul.f32 %v4865_v63, %v1585_v12  ;;  %v1588_v30 = vsub.f32 %v5978_v34, %v4858_v54 }
 0x2f9   : > { %v1645_v25 = vmul.f32 %v1628_v45, %v1609_v42  ;;  %v1610_v62 = vmul.f32 %v4875_v14, %v1578_v38  ;;  %v1612_v31 = vmul.f32 %v4878_v55, %v1580_v15  ;;  %v1647_v33 = vmul.f32 %v1628_v45, %v1611_v27 }
 0x2fa   : > { %v1614_v56 = vmul.f32 %v4875_v14, %v1582_v50  ;;  %v1649_v60 = vmul.f32 %v1633_v57, %v1613_v51  ;;  %v1616_v1 = vmul.f32 %v4878_v55, %v1584_v59  ;;  %v1651_v4 = vmul.f32 %v1633_v57, %v1615_v61  ;;  %v5982_v50 = vld [vmem:[#allocation54_spill] sm:$0xff] }
 0x2fb   : > { %v4884_v32 = vadd.f32 %v1664_v23, %v1645_v25  ;;  %v1646_v26 = vmul.f32 %v1628_v45, %v1610_v62  ;;  %v1648_v37 = vmul.f32 %v1628_v45, %v1612_v31  ;;  %v4892_v40 = vadd.f32 %v1664_v23, %v1647_v33  ;;  %v5979_v62 = vld [vmem:[#allocation55_spill] sm:$0xff]  ;;  %v1643_v49 = vpop.permute.xlu0 %1642  ;;  %v1679_v53 = vpop.permute.xlu1 %1678  ;;  %v2150_v59 = vld [vmem:[%s5765_s9 + $0x18] sm:$0xff] }
 0x2fc   : > { %v1650_v0 = vmul.f32 %v1633_v57, %v1614_v56  ;;  %v4920_v3 = vadd.f32 %v1669_v2, %v1649_v60  ;;  %v1652_v8 = vmul.f32 %v1633_v57, %v1616_v1  ;;  %v4928_v9 = vadd.f32 %v1669_v2, %v1651_v4  ;;  %v2149_v60 = vld [vmem:[%s5765_s9 + $0x10] sm:$0xff]  ;;  %v2154_v61 = vld [vmem:[%s5766_s10 + $0x18] sm:$0xff]  ;;  %v2147_v4 = vld [vmem:[%s5765_s9] sm:$0xff] }
 0x2fd   : > { %1754 = vrot.lane.b32.xlu1 %v4884_v32, %s3893_s3  ;;  %v4888_v36 = vadd.f32 %v1664_v23, %v1646_v26  ;;  %v4898_v48 = vadd.f32 %v1664_v23, %v1648_v37  ;;  %v1618_v43 = vmul.f32 %v4875_v14, %v1586_v19  ;;  %v1653_v39 = vmul.f32 %v1638_v46, %v1617_v20  ;;  %v5980_v26 = vld [vmem:[#allocation53_spill] sm:$0xff]  ;;  %v2972_v19 = vld [vmem:[%s5768_s12] sm:$0xff] }
 0x2fe   : > { %v4924_v5 = vadd.f32 %v1669_v2, %v1650_v0  ;;  %v4934_v13 = vadd.f32 %v1669_v2, %v1652_v8  ;;  %v1619_v38 = vmul.f32 %v4868_v24, %v1587_v28  ;;  %v1620_v15 = vmul.f32 %v4878_v55, %v1588_v30  ;;  %v2148_v0 = vld [vmem:[%s5765_s9 + $0x8] sm:$0xff]  ;;  %v2153_v2 = vld [vmem:[%s5766_s10 + $0x10] sm:$0xff] }
 0x2ff   : > { %1762 = vrot.lane.b32.xlu0 %v4888_v36, %s3893_s3  ;;  %v1654_v17 = vmul.f32 %v1638_v46, %v1618_v43  ;;  %v4956_v7 = vadd.f32 %v1674_v22, %v1653_v39  ;;  %v1589_v31 = vsub.f32 %v5979_v62, %v4849_v21  ;;  %v1590_v33 = vsub.f32 %v5980_v26, %v4855_v35  ;;  %v1810_v1 = vpop.permute.xlu0 %1809  ;;  %v1883_v8 = vpop.permute.xlu1 %1882 }
 0x300   : > { %v1655_v42 = vmul.f32 %v1638_v46, %v1619_v38  ;;  %v1656_v45 = vmul.f32 %v1638_v46, %v1620_v15  ;;  %v1591_v44 = vsub.f32 %v5981_v41, %v4852_v6  ;;  %v1592_v51 = vsub.f32 %v5982_v50, %v4858_v54 }
 0x301   : > { %1770 = vrot.lane.b32.xlu1 %v4892_v40, %s3893_s3  ;;  %v4960_v27 = vadd.f32 %v1674_v22, %v1654_v17  ;;  %v1621_v37 = vmul.f32 %v4865_v63, %v1589_v31  ;;  %v1622_v21 = vmul.f32 %v4875_v14, %v1590_v33 }
 0x302   : > { %v4964_v25 = vadd.f32 %v1674_v22, %v1655_v42  ;;  %v4970_v23 = vadd.f32 %v1674_v22, %v1656_v45  ;;  %v1623_v52 = vmul.f32 %v4868_v24, %v1591_v44  ;;  %v1624_v6 = vmul.f32 %v4878_v55, %v1592_v51 }
 0x303   : > { %1778 = vrot.lane.b32.xlu0 %v4898_v48, %s3893_s3  ;;  %v1657_v35 = vmul.f32 %v1643_v49, %v1621_v37  ;;  %v1658_v63 = vmul.f32 %v1643_v49, %v1622_v21  ;;  %v5040_v12 = vpop.permute.xlu0 %1992  ;;  %v5048_v20 = vpop.permute.xlu1 %2064  ;;  %v5074_v42 = vand.u32 127, %v1561_v11 }
 0x304   : > { %v1659_v56 = vmul.f32 %v1643_v49, %v1623_v52  ;;  %v1660_v57 = vmul.f32 %v1643_v49, %v1624_v6 }
 0x305   : > { %1937 = vrot.lane.b32.xlu1 %v4884_v32, %s3894_s20  ;;  %v4992_v14 = vadd.f32 %v1679_v53, %v1657_v35  ;;  %v4996_v54 = vadd.f32 %v1679_v53, %v1658_v63  ;;  %v1699_v31 = vadd.s32 128, %v5074_v42  ;;  %vm1786_vm3 = vcmp.lt.s32.totalorder %v5074_v42, 1 }
 0x306   : > { %v5000_v24 = vadd.f32 %v1679_v53, %v1659_v56  ;;  %v5004_v55 = vadd.f32 %v1679_v53, %v1660_v57  ;;  %v1700_v33 = vadd.s32 256, %v5074_v42  ;;  %v1701_v37 = vadd.s32 384, %v5074_v42 }
 0x307   : > { %1945 = vrot.lane.b32.xlu0 %v4888_v36, %s3894_s20  ;;  %v5053_v28 = vpop.permute.xlu0 %1814  ;;  %v5055_v43 = vpop.permute.xlu1 %1887  ;;  %v1713_v44 = vand.u32 127, %v1699_v31  ;;  %vm1803_vm4 = vcmp.ge.s32.totalorder %v5074_v42, 1  ;;  %vm1969_vm5 = vcmp.lt.s32.totalorder %v5074_v42, 127  ;;  %v1901_v57 = vmul.f32 %v1883_v8, %v4888_v36  ;;  %v3795_v42 = vld [vmem:[%s5757_s1 + $0x80] sm:$0xff] }
 0x308   : > { %v1720_v49 = vand.u32 127, %v1700_v33  ;;  %v1727_v51 = vand.u32 127, %v1701_v37 }
 0x309   : > { %1953 = vrot.lane.b32.xlu1 %v4892_v40, %s3894_s20  ;;  %vm5094_vm6 = vcmp.ge.s32.totalorder %v1713_v44, 1  ;;  %vm5117_vm9 = vcmp.lt.s32.totalorder %v1713_v44, 127 }
 0x30a   : > { %vm5102_vm7 = vcmp.ge.s32.totalorder %v1720_v49, 1  ;;  %vm5106_vm8 = vcmp.ge.s32.totalorder %v1727_v51, 1  ;;  %vm5123_vm10 = vcmp.lt.s32.totalorder %v1720_v49, 127  ;;  %vm5127_vm11 = vcmp.lt.s32.totalorder %v1727_v51, 127 }
 0x30b   : > { %1961 = vrot.lane.b32.xlu0 %v4898_v48, %s3894_s20  ;;  %v5057_v46 = vpop.permute.xlu0 %1997  ;;  %v5059_v34 = vpop.permute.xlu1 %1819 }
 0x30d   : > { %1756 = vrot.lane.b32.xlu1 %v4920_v3, %s3893_s3 }
 0x30f   : > { %1764 = vrot.lane.b32.xlu0 %v4924_v5, %s3893_s3  ;;  %v5061_v30 = vpop.permute.xlu0 %1892  ;;  %v5063_v39 = vpop.permute.xlu1 %2002 }
 0x311   : > { %1772 = vrot.lane.b32.xlu1 %v4928_v9, %s3893_s3 }
 0x313   : > { %1780 = vrot.lane.b32.xlu0 %v4934_v13, %s3893_s3  ;;  %v5065_v38 = vpop.permute.xlu0 %2069  ;;  %v5067_v17 = vpop.permute.xlu1 %1824 }
 0x315   : > { %1939 = vrot.lane.b32.xlu1 %v4920_v3, %s3894_s20 }
 0x317   : > { %1947 = vrot.lane.b32.xlu0 %v4924_v5, %s3894_s20  ;;  %v5069_v15 = vpop.permute.xlu0 %1897  ;;  %v5071_v22 = vpop.permute.xlu1 %2007 }
 0x318   : > { %v1914_v56 = vmul.f32 %v5069_v15, %v5000_v24 }
 0x319   : > { %1955 = vrot.lane.b32.xlu1 %v4928_v9, %s3894_s20 }
 0x31b   : > { %1963 = vrot.lane.b32.xlu0 %v4934_v13, %s3894_s20  ;;  %v5076_v45 = vpop.permute.xlu0 %2074 }
 0x31d   : > { %1758 = vrot.lane.b32.xlu1 %v4956_v7, %s3893_s3 }
 0x31f   : > { %1766 = vrot.lane.b32.xlu0 %v4960_v27, %s3893_s3 }
 0x321   : > { %1774 = vrot.lane.b32.xlu1 %v4964_v25, %s3893_s3 }
 0x323   : > { %1782 = vrot.lane.b32.xlu0 %v4970_v23, %s3893_s3 }
 0x325   : > { %1941 = vrot.lane.b32.xlu1 %v4956_v7, %s3894_s20 }
 0x327   : > { %1949 = vrot.lane.b32.xlu0 %v4960_v27, %s3894_s20 }
 0x329   : > { %1957 = vrot.lane.b32.xlu1 %v4964_v25, %s3894_s20 }
 0x32b   : > { %1965 = vrot.lane.b32.xlu0 %v4970_v23, %s3894_s20 }
 0x32d   : > { %1760 = vrot.lane.b32.xlu1 %v4992_v14, %s3893_s3 }
 0x32f   : > { %1768 = vrot.lane.b32.xlu0 %v4996_v54, %s3893_s3 }
 0x331   : > { %1776 = vrot.lane.b32.xlu1 %v5000_v24, %s3893_s3 }
 0x333   : > { %1784 = vrot.lane.b32.xlu0 %v5004_v55, %s3893_s3  ;;  %s5705_s3 = scalar_lea.hbm %s5770_s14, %s3317_s22 }
 0x335   : > { %1943 = vrot.lane.b32.xlu1 %v4992_v14, %s3894_s20 }
 0x337   : > { %1951 = vrot.lane.b32.xlu0 %v4996_v54, %s3894_s20 }
 0x339   : > { %1959 = vrot.lane.b32.xlu1 %v5000_v24, %s3894_s20 }
 0x33b   : > { %1967 = vrot.lane.b32.xlu0 %v5004_v55, %s3894_s20  ;;  %s5715_s20 = scalar_lea.sflag [#allocation4], %s5997_s19 }
 0x33d   : > { %2079 = vperm.xlu1 %3728, %v2061_v58   ;;  %v1902_v58 = vmul.f32 %v1883_v8, %v4892_v40 }
 0x33f   : > { %2915 = vperm.xlu0 %3727, %v2150_v59  }
 0x341   : > { %2910 = vperm.xlu1 %3728, %v2149_v60  }
 0x343   : > { %2951 = vperm.xlu0 %3727, %v2154_v61  }
 0x345   : > { %2905 = vperm.xlu1 %3728, %v2148_v0  }
 0x347   : > { %2946 = vperm.xlu0 %3727, %v2153_v2  }
 0x349   : > { %2900 = vperm.xlu1 %3728, %v2147_v4  }
 0x34b   : > { %2941 = vperm.xlu0 %3727, %v2152_v10   ;;  %v1900_v10 = vmul.f32 %v1883_v8, %v4884_v32 }
 0x34d   : > { %2936 = vperm.xlu1 %3728, %v2151_v16  }
 0x34f   : > { %2976 = vperm.xlu0 %3727, %v2972_v19   ;;  %v3797_v19 = vld [vmem:[%s5757_s1 + $0x100] sm:$0xff] }
 0x351   : > { %2981 = vperm.xlu1 %3728, %v2973_v29  }
 0x36f   : > { %v1755_v62 = vpop.permute.xlu1 %1754 }
 0x371   : > { %v1763_v26 = vpop.permute.xlu0 %1762 }
 0x372   : > { %v1795_v21 = vsel %vm1786_vm3, %v1755_v62, %v1763_v26 }
 0x373   : > { %v1771_v41 = vpop.permute.xlu1 %1770  ;;  %v1828_v63 = vmul.f32 %v1810_v1, %v1795_v21 }
 0x374   : > { %v1791_v50 = vsel %vm1786_vm3, %v1763_v26, %v1771_v41 }
 0x375   : > { %v1779_v11 = vpop.permute.xlu0 %1778  ;;  %v1829_v59 = vmul.f32 %v1810_v1, %v1791_v50  ;;  %v1844_v40 = vsel %vm5094_vm6, %v1828_v63, 0.0  ;;  %v5147_v63 = vstv %s5092_s21  ;;  %s3895_s21 = smov [#allocation6]  }
 0x376   : > { %v1787_v35 = vsel %vm1786_vm3, %v1771_v41, %v1779_v11  ;;  %v1799_v52 = vsel %vm1786_vm3, %v1779_v11, %v1755_v62  ;;  %v1917_v44 = vadd.f32 %v1901_v57, %v1844_v40  ;;  %s3828_s13 = sshll.u32 %s3895_s21, 4  ;;  %s3829_s13 = int_to_ptr.vmem [resolvable:$false] %s3828_s13 }
 0x377   : > { %v1827_v6 = vmul.f32 %v1810_v1, %v1799_v52  ;;  %v1938_v53 = vpop.permute.xlu1 %1937  ;;  %v1830_v60 = vmul.f32 %v1810_v1, %v1787_v35  ;;  %v1903_v1 = vmul.f32 %v1883_v8, %v4898_v48  ;;  %v1845_v48 = vsel %vm5102_vm7, %v1829_v59, 0.0  ;;  %s3830_s27 = scalar_lea.vmem %s3829_s13, 2048  ;;  %p3831_p13 = scmp.lt.s32.totalorder %s5696_s18, %s3829_s13 }
 0x378   : > { %p3832_p0 = scmp.lt.s32.totalorder %s3830_s27, %s3824_s26 }
 0x379   : > { %v1843_v61 = vsel %vm1803_vm4, %v1827_v6, 0.0  ;;  %v1946_v0 = vpop.permute.xlu0 %1945  ;;  %v1846_v8 = vsel %vm5106_vm8, %v1830_v60, 0.0  ;;  %v1918_v6 = vadd.f32 %v1902_v58, %v1845_v48 }
 0x37a   : > { %v1978_v36 = vsel %vm1969_vm5, %v1938_v53, %v1946_v0  ;;  %v1916_v62 = vadd.f32 %v1900_v10, %v1843_v61  ;;  %v1919_v59 = vadd.f32 %v1903_v1, %v1846_v8  ;;  %p3833_p1 = por %p3832_p0, %p3831_p13 }
 0x37b   : > { %v2010_v16 = vmul.f32 %v5040_v12, %v1978_v36  ;;  %v1954_v29 = vpop.permute.xlu1 %1953 }
 0x37c   : > { %v1974_v31 = vsel %vm1969_vm5, %v1946_v0, %v1954_v29  ;;  %p3834_p2 = pnand %p3833_p1, %p3827_p12 }
 0x37d   : > { %v2026_v33 = vsel %vm1969_vm5, %v2010_v16, 0.0  ;;  %v2011_v37 = vmul.f32 %v5040_v12, %v1974_v31  ;;  %v1962_v41 = vpop.permute.xlu0 %1961 }
 0x37e   : > { %v2042_v21 = vadd.f32 %v2026_v33, %v1916_v62  ;;  %v1970_v49 = vsel %vm1969_vm5, %v1954_v29, %v1962_v41  ;;  %v1982_v11 = vsel %vm1969_vm5, %v1962_v41, %v1938_v53 }
 0x37f   : > { %v2027_v50 = vsel %vm5117_vm9, %v2011_v37, 0.0  ;;  %v2012_v51 = vmul.f32 %v5040_v12, %v1970_v49  ;;  %v2013_v35 = vmul.f32 %v5040_v12, %v1982_v11  ;;  %v1757_v52 = vpop.permute.xlu1 %1756 }
 0x380   : > { %v2082_v57 = vadd.f32 %v5048_v20, %v2042_v21  ;;  %v2043_v60 = vadd.f32 %v2027_v50, %v1917_v44  ;;  %v1905_v50 = vmul.f32 %v5055_v43, %v4924_v5 }
 0x381   : > { %v2028_v61 = vsel %vm5123_vm10, %v2012_v51, 0.0  ;;  %v2029_v53 = vsel %vm5127_vm11, %v2013_v35, 0.0  ;;  %v1765_v0 = vpop.permute.xlu0 %1764 }
 0x382   : > { %v2044_v10 = vadd.f32 %v2028_v61, %v1918_v6  ;;  %v2045_v36 = vadd.f32 %v2029_v53, %v1919_v59  ;;  %v2083_v40 = vadd.f32 %v5048_v20, %v2043_v60  ;;  %v1796_v12 = vsel %vm1786_vm3, %v1757_v52, %v1765_v0  ;;  %v3737_v59 = vld [vmem:[%s5757_s1 + $0x78] sm:$0xff]  ;;  %v3738_v61 = vld [vmem:[%s5757_s1 + $0xf0] sm:$0xff] }
 0x383   : > { %v1773_v16 = vpop.permute.xlu1 %1772  ;;  %v2115_v58 = vmul.f32 %v5147_v63, %v2082_v57  ;;  %vm2098_vm13 = vcmp.gt.f32.partialorder %v2082_v57, 0.0  ;;  %v1832_v8 = vmul.f32 %v5053_v28, %v1796_v12  ;;  %v1904_v60 = vmul.f32 %v5055_v43, %v4920_v3 }
 0x384   : > { %v2084_v1 = vadd.f32 %v5048_v20, %v2044_v10  ;;  %vm2099_vm12 = vcmp.gt.f32.partialorder %v2083_v40, 0.0  ;;  %v2116_v29 = vmul.f32 %v5147_v63, %v2083_v40  ;;  %v1792_v62 = vsel %vm1786_vm3, %v1765_v0, %v1773_v16 }
 0x385   : > { %v1781_v31 = vpop.permute.xlu0 %1780  ;;  %v2085_v48 = vadd.f32 %v5048_v20, %v2045_v36  ;;  %v5172_v49 = vsel %vm2098_vm13, %v2082_v57, %v2115_v58  ;;  %v1833_v11 = vmul.f32 %v5053_v28, %v1792_v62  ;;  %v1848_v57 = vsel %vm5094_vm6, %v1832_v8, 0.0  ;;  %v3739_v36 = vld [vmem:[%s5757_s1 + $0x70] sm:$0xff]  ;;  %v3740_v58 = vld [vmem:[%s5757_s1 + $0xe8] sm:$0xff] }
 0x386   : > { %v1788_v33 = vsel %vm1786_vm3, %v1773_v16, %v1781_v31  ;;  %v1800_v37 = vsel %vm1786_vm3, %v1781_v31, %v1757_v52  ;;  %v5168_v41 = vsel %vm2099_vm12, %v2083_v40, %v2116_v29  ;;  %vm2100_vm15 = vcmp.gt.f32.partialorder %v2084_v1, 0.0  ;;  %v3741_v31 = vld [vmem:[%s5757_s1 + $0x178] sm:$0xff] }
 0x387   : > { %v1831_v44 = vmul.f32 %v5053_v28, %v1800_v37  ;;  %v1940_v21 = vpop.permute.xlu1 %1939  ;;  %2219 = vmatprep.mubr.f32.mxu0 %v5168_v41  ;;  %vm2101_vm14 = vcmp.gt.f32.partialorder %v2085_v48, 0.0  ;;  %v2118_v20 = vmul.f32 %v5147_v63, %v2085_v48  ;;  %v1834_v51 = vmul.f32 %v5053_v28, %v1788_v33 }
 0x388   : > { %2220 = vmatmul.mubr.f32.vlgmr.msra.gmra.mxu0 %v5172_v49  ;;  %v2117_v6 = vmul.f32 %v5147_v63, %v2084_v1  ;;  %v1906_v53 = vmul.f32 %v5055_v43, %v4928_v9  ;;  %v1849_v40 = vsel %vm5102_vm7, %v1833_v11, 0.0  ;;  %v1907_v12 = vmul.f32 %v5055_v43, %v4934_v13  ;;  %v3744_v11 = vld [vmem:[%s5757_s1 + $0xe0] sm:$0xff] }
 0x389   : > { %v1847_v35 = vsel %vm1803_vm4, %v1831_v44, 0.0  ;;  %v1948_v52 = vpop.permute.xlu0 %1947  ;;  %3583 = vmatpush3.msra.mxu0 %v3737_v59  ;;  %v5190_v5 = vsel %vm2101_vm14, %v2085_v48, %v2118_v20  ;;  %v1850_v29 = vsel %vm5106_vm8, %v1834_v51, 0.0  ;;  %v3742_v48 = vld [vmem:[%s5757_s1 + $0x68] sm:$0xff]  ;;  %v3743_v44 = vld [vmem:[%s5757_s1 + $0x1f0] sm:$0xff] }
 0x38a   : > { %v1979_v28 = vsel %vm1969_vm5, %v1940_v21, %v1948_v52  ;;  %3584 = vmatprep.subr.mxu0 %v3738_v61  ;;  %2304 = vmatprep.mubr.f32.mxu1 %v5190_v5  ;;  %v5202_v10 = vsel %vm2100_vm15, %v2084_v1, %v2117_v6  ;;  %v1920_v9 = vadd.f32 %v1904_v60, %v1847_v35  ;;  %v3746_v6 = vld [vmem:[%s5757_s1 + $0x60] sm:$0xff] }
 0x38b   : > { %v2014_v0 = vmul.f32 %v5057_v46, %v1979_v28  ;;  %v1956_v3 = vpop.permute.xlu1 %1955  ;;  %3585 = vmatpush3.msra.mxu0 %v3739_v36  ;;  %2305 = vmatmul.mubr.f32.vlgmr.msra.gmra.mxu1 %v5202_v10  ;;  %v1921_v1 = vadd.f32 %v1905_v50, %v1848_v57  ;;  %v1922_v20 = vadd.f32 %v1906_v53, %v1849_v40  ;;  %v3747_v28 = vld [vmem:[%s5757_s1 + $0x1e8] sm:$0xff]  ;;  %v3750_v36 = vld [vmem:[%s5757_s1 + $0x58] sm:$0xff] }
 0x38c   : > { %v1975_v16 = vsel %vm1969_vm5, %v1948_v52, %v1956_v3  ;;  %3586 = vmatprep.subr.mxu0 %v3740_v58  ;;  %3627 = vmatpush3.msra.mxu1 %v3741_v31  ;;  %v1923_v59 = vadd.f32 %v1907_v12, %v1850_v29 }
 0x38d   : > { %v2030_v62 = vsel %vm1969_vm5, %v2014_v0, 0.0  ;;  %v2015_v13 = vmul.f32 %v5057_v46, %v1975_v16  ;;  %v1964_v43 = vpop.permute.xlu0 %1963  ;;  %3587 = vmatpush3.msra.mxu0 %v3742_v48  ;;  %3628 = vmatprep.subr.mxu1 %v3743_v44  ;;  %v3751_v16 = vld [vmem:[%s5757_s1 + $0x1e0] sm:$0xff] }
 0x38e   : > { %v2046_v8 = vadd.f32 %v2030_v62, %v1920_v9  ;;  %v1971_v33 = vsel %vm1969_vm5, %v1956_v3, %v1964_v43  ;;  %v1983_v37 = vsel %vm1969_vm5, %v1964_v43, %v1940_v21  ;;  %3588 = vmatprep.subr.mxu0 %v3744_v11  ;;  %v3745_v21 = vld [vmem:[%s5757_s1 + $0x170] sm:$0xff]  ;;  %v3749_v3 = vld [vmem:[%s5757_s1 + $0x168] sm:$0xff]  ;;  %v3752_v62 = vld [vmem:[%s5757_s1 + $0x160] sm:$0xff] }
 0x38f   : > { %v2031_v50 = vsel %vm5117_vm9, %v2015_v13, 0.0  ;;  %v2016_v51 = vmul.f32 %v5057_v46, %v1971_v33  ;;  %v2017_v35 = vmul.f32 %v5057_v46, %v1983_v37  ;;  %v1759_v52 = vpop.permute.xlu1 %1758  ;;  %3629 = vmatpush3.msra.mxu1 %v3745_v21  ;;  %3589 = vmatpush3.msra.mxu0 %v3746_v6  ;;  %v3748_v46 = vld [vmem:[%s5757_s1 + $0xd8] sm:$0xff]  ;;  %v3753_v13 = vld [vmem:[%s5757_s1 + $0xd0] sm:$0xff]  ;;  %v1910_v37 = vmul.f32 %v5061_v30, %v4964_v25 }
 0x390   : > { %v2047_v57 = vadd.f32 %v2031_v50, %v1921_v1  ;;  %v2086_v60 = vadd.f32 %v5065_v38, %v2046_v8  ;;  %3630 = vmatprep.subr.mxu1 %v3747_v28  ;;  %3590 = vmatprep.subr.mxu0 %v3748_v46  ;;  %v3754_v8 = vld [vmem:[%s5757_s1 + $0x1d8] sm:$0xff]  ;;  %v3755_v33 = vld [vmem:[%s5757_s1 + $0x50] sm:$0xff] }
 0x391   : > { %v2032_v61 = vsel %vm5123_vm10, %v2016_v51, 0.0  ;;  %v2033_v53 = vsel %vm5127_vm11, %v2017_v35, 0.0  ;;  %v1767_v0 = vpop.permute.xlu0 %1766  ;;  %3631 = vmatpush3.msra.mxu1 %v3749_v3  ;;  %3591 = vmatpush3.msra.mxu0 %v3750_v36  ;;  %v3756_v50 = vld [vmem:[%s5757_s1 + $0x158] sm:$0xff]  ;;  %v3757_v51 = vld [vmem:[%s5757_s1 + $0xc8] sm:$0xff]  ;;  %v3758_v6 = vld [vmem:[%s5757_s1 + $0x1d0] sm:$0xff] }
 0x392   : > { %v2048_v40 = vadd.f32 %v2032_v61, %v1922_v20  ;;  %v2049_v12 = vadd.f32 %v2033_v53, %v1923_v59  ;;  %v2087_v9 = vadd.f32 %v5065_v38, %v2047_v57  ;;  %3632 = vmatprep.subr.mxu1 %v3751_v16  ;;  %v1797_v58 = vsel %vm1786_vm3, %v1759_v52, %v1767_v0 }
 0x393   : > { %v1775_v1 = vpop.permute.xlu1 %1774  ;;  %vm2102_vm0 = vcmp.gt.f32.partialorder %v2086_v60, 0.0  ;;  %v2119_v29 = vmul.f32 %v5147_v63, %v2086_v60  ;;  %3633 = vmatpush3.msra.mxu1 %v3752_v62  ;;  %3592 = vmatprep.subr.mxu0 %v3753_v13  ;;  %v1836_v35 = vmul.f32 %v5059_v34, %v1797_v58  ;;  %v1909_v62 = vmul.f32 %v5061_v30, %v4960_v27 }
 0x394   : > { %v1793_v43 = vsel %vm1786_vm3, %v1767_v0, %v1775_v1  ;;  %vm2103_vm12 = vcmp.gt.f32.partialorder %v2087_v9, 0.0  ;;  %v2120_v31 = vmul.f32 %v5147_v63, %v2087_v9  ;;  %v2089_v48 = vadd.f32 %v5065_v38, %v2049_v12  ;;  %3634 = vmatprep.subr.mxu1 %v3754_v8  ;;  %3593 = vmatpush3.msra.mxu0 %v3755_v33  ;;  %v3761_v12 = vld [vmem:[%s5757_s1 + $0x48] sm:$0xff]  ;;  %v3765_v33 = vld [vmem:[%s5757_s1 + $0x40] sm:$0xff] }
 0x395   : > { %v1837_v44 = vmul.f32 %v5059_v34, %v1793_v43  ;;  %v1783_v11 = vpop.permute.xlu0 %1782  ;;  %v2088_v20 = vadd.f32 %v5065_v38, %v2048_v40  ;;  %3635 = vmatpush3.msra.mxu1 %v3756_v50  ;;  %3594 = vmatprep.subr.mxu0 %v3757_v51  ;;  %v5314_v46 = vsel %vm2102_vm0, %v2086_v60, %v2119_v29  ;;  %v3760_v60 = vld [vmem:[%s5757_s1 + $0x1c8] sm:$0xff]  ;;  %v1852_v16 = vsel %vm5094_vm6, %v1836_v35, 0.0  ;;  %v3763_v29 = vld [vmem:[%s5757_s1 + $0xc0] sm:$0xff]  ;;  %v3767_v50 = vld [vmem:[%s5757_s1 + $0xb8] sm:$0xff] }
 0x396   : > { %v1789_v25 = vsel %vm1786_vm3, %v1775_v1, %v1783_v11  ;;  %v1801_v21 = vsel %vm1786_vm3, %v1783_v11, %v1759_v52  ;;  %v5304_v38 = vsel %vm2103_vm12, %v2087_v9, %v2120_v31  ;;  %3636 = vmatprep.subr.mxu1 %v3758_v6  ;;  %vm2105_vm13 = vcmp.gt.f32.partialorder %v2089_v48, 0.0  ;;  %v3759_v52 = vld [vmem:[%s5757_s1 + $0x150] sm:$0xff]  ;;  %3595 = vmatpush3.msra.mxu0 %v3761_v12  ;;  %v3762_v9 = vld [vmem:[%s5757_s1 + $0x148] sm:$0xff]  ;;  %v3764_v31 = vld [vmem:[%s5757_s1 + $0x1c0] sm:$0xff] }
 0x397   : > { %v1853_v59 = vsel %vm5102_vm7, %v1837_v44, 0.0  ;;  %v1835_v57 = vmul.f32 %v5059_v34, %v1801_v21  ;;  %v1942_v28 = vpop.permute.xlu1 %1941  ;;  %2224 = vmatprep.mubr.f32.mxu0 %v5304_v38  ;;  %3637 = vmatpush3.msra.mxu1 %v3759_v52  ;;  %v2122_v53 = vmul.f32 %v5147_v63, %v2089_v48  ;;  %vm2104_vm14 = vcmp.gt.f32.partialorder %v2088_v20, 0.0  ;;  %v3768_v21 = vld [vmem:[%s5757_s1 + $0x1b8] sm:$0xff] }
 0x398   : > { %v5319_v61 = vadd.f32 %v1910_v37, %v1853_v59  ;;  %2225 = vmatmul.mubr.f32.gmra.mxu0 %v5314_v46  ;;  %v2121_v0 = vmul.f32 %v5147_v63, %v2088_v20  ;;  %3638 = vmatprep.subr.mxu1 %v3760_v60  ;;  %v1838_v3 = vmul.f32 %v5059_v34, %v1789_v25  ;;  %v3769_v6 = vld [vmem:[%s5757_s1 + $0x38] sm:$0xff] }
 0x399   : > { %v1851_v36 = vsel %vm1803_vm4, %v1835_v57, 0.0  ;;  %v1950_v40 = vpop.permute.xlu0 %1949  ;;  %3639 = vmatpush3.msra.mxu1 %v3762_v9  ;;  %v1908_v34 = vmul.f32 %v5061_v30, %v4956_v7  ;;  %v5341_v58 = vsel %vm2105_vm13, %v2089_v48, %v2122_v53  ;;  %3596 = vmatprep.subr.mxu0 %v3763_v29  ;;  %v1911_v48 = vmul.f32 %v5061_v30, %v4970_v23 }
 0x39a   : > { %v1980_v1 = vsel %vm1969_vm5, %v1942_v28, %v1950_v40  ;;  %2309 = vmatprep.mubr.f32.mxu1 %v5341_v58  ;;  %v5353_v7 = vsel %vm2104_vm14, %v2088_v20, %v2121_v0  ;;  %3640 = vmatprep.subr.mxu1 %v3764_v31  ;;  %v1925_v37 = vadd.f32 %v1909_v62, %v1852_v16  ;;  %v1854_v44 = vsel %vm5106_vm8, %v1838_v3, 0.0  ;;  %v3766_v20 = vld [vmem:[%s5757_s1 + $0x140] sm:$0xff]  ;;  %v3771_v0 = vld [vmem:[%s5757_s1 + $0xb0] sm:$0xff]  ;;  %v3776_v31 = vld [vmem:[%s5757_s1 + $0x1a8] sm:$0xff] }
 0x39b   : > { %v2018_v13 = vmul.f32 %v5063_v39, %v1980_v1  ;;  %v1958_v43 = vpop.permute.xlu1 %1957  ;;  %v1924_v8 = vadd.f32 %v1908_v34, %v1851_v36  ;;  %2310 = vmatmul.mubr.f32.gmra.mxu1 %v5353_v7  ;;  %3597 = vmatpush3.msra.mxu0 %v3765_v33  ;;  %v1927_v60 = vadd.f32 %v1911_v48, %v1854_v44  ;;  %v3774_v34 = vld [vmem:[%s5757_s1 + $0x130] sm:$0xff]  ;;  %v3775_v1 = vld [vmem:[%s5757_s1 + $0xa8] sm:$0xff]  ;;  %v3779_v44 = vld [vmem:[%s5757_s1 + $0xa0] sm:$0xff] }
 0x39c   : > { %v1976_v27 = vsel %vm1969_vm5, %v1950_v40, %v1958_v43  ;;  %3641 = vmatpush3.msra.mxu1 %v3766_v20  ;;  %3598 = vmatprep.subr.mxu0 %v3767_v50  ;;  %v3772_v40 = vld [vmem:[%s5757_s1 + $0x1b0] sm:$0xff]  ;;  %v3781_v50 = vld [vmem:[%s5757_s1 + $0x120] sm:$0xff] }
 0x39d   : > { %v2034_v11 = vsel %vm1969_vm5, %v2018_v13, 0.0  ;;  %v2019_v23 = vmul.f32 %v5063_v39, %v1976_v27  ;;  %v1966_v30 = vpop.permute.xlu0 %1965  ;;  %3642 = vmatprep.subr.mxu1 %v3768_v21  ;;  %3599 = vmatpush3.msra.mxu0 %v3769_v6  ;;  %v3777_v27 = vld [vmem:[%s5757_s1 + $0x28] sm:$0xff]  ;;  %v3783_v6 = vld [vmem:[%s5757_s1 + $0x98] sm:$0xff] }
 0x39e   : > { %v2050_v51 = vadd.f32 %v2034_v11, %v1924_v8  ;;  %v1972_v35 = vsel %vm1969_vm5, %v1958_v43, %v1966_v30  ;;  %v1984_v25 = vsel %vm1969_vm5, %v1966_v30, %v1942_v28  ;;  %v3770_v28 = vld [vmem:[%s5757_s1 + $0x138] sm:$0xff]  ;;  %3600 = vmatprep.subr.mxu0 %v3771_v0  ;;  %v3780_v11 = vld [vmem:[%s5757_s1 + $0x1a0] sm:$0xff] }
 0x39f   : > { %v2035_v59 = vsel %vm5117_vm9, %v2019_v23, 0.0  ;;  %v2020_v57 = vmul.f32 %v5063_v39, %v1972_v35  ;;  %v2021_v52 = vmul.f32 %v5063_v39, %v1984_v25  ;;  %v1761_v53 = vpop.permute.xlu1 %1760  ;;  %3643 = vmatpush3.msra.mxu1 %v3770_v28  ;;  %v3773_v39 = vld [vmem:[%s5757_s1 + $0x30] sm:$0xff]  ;;  %v1913_v28 = vmul.f32 %v5069_v15, %v4996_v54 }
 0x3a0   : > { %v2051_v3 = vadd.f32 %v2035_v59, %v1925_v37  ;;  %v2090_v36 = vadd.f32 %v5076_v45, %v2050_v51  ;;  %3644 = vmatprep.subr.mxu1 %v3772_v40  ;;  %3601 = vmatpush3.msra.mxu0 %v3773_v39  ;;  %v3782_v51 = vld [vmem:[%s5757_s1 + $0x20] sm:$0xff] }
 0x3a1   : > { %v2036_v12 = vsel %vm5123_vm10, %v2020_v57, 0.0  ;;  %v2037_v9 = vsel %vm5127_vm11, %v2021_v52, 0.0  ;;  %v1769_v16 = vpop.permute.xlu0 %1768  ;;  %3645 = vmatpush3.msra.mxu1 %v3774_v34  ;;  %3602 = vmatprep.subr.mxu0 %v3775_v1 }
 0x3a2   : > { %v2052_v29 = vadd.f32 %v2036_v12, %v5319_v61  ;;  %v2053_v62 = vadd.f32 %v2037_v9, %v1927_v60  ;;  %v1798_v13 = vsel %vm1786_vm3, %v1761_v53, %v1769_v16  ;;  %v2091_v43 = vadd.f32 %v5076_v45, %v2051_v3  ;;  %3646 = vmatprep.subr.mxu1 %v3776_v31  ;;  %v3778_v61 = vld [vmem:[%s5757_s1 + $0x128] sm:$0xff]  ;;  %v3785_v3 = vld [vmem:[%s5757_s1 + $0x118] sm:$0xff] }
 0x3a3   : > { %v1777_v48 = vpop.permute.xlu1 %1776  ;;  %v2123_v8 = vmul.f32 %v5147_v63, %v2090_v36  ;;  %3603 = vmatpush3.msra.mxu0 %v3777_v27  ;;  %3647 = vmatpush3.msra.mxu1 %v3778_v61  ;;  %vm2106_vm0 = vcmp.gt.f32.partialorder %v2090_v36, 0.0  ;;  %v1840_v23 = vmul.f32 %v5067_v17, %v1798_v13  ;;  %v3786_v9 = vld [vmem:[%s5757_s1 + $0x18] sm:$0xff] }
 0x3a4   : > { %vm2107_vm15 = vcmp.gt.f32.partialorder %v2091_v43, 0.0  ;;  %v2124_v33 = vmul.f32 %v5147_v63, %v2091_v43  ;;  %v2093_v37 = vadd.f32 %v5076_v45, %v2053_v62  ;;  %3604 = vmatprep.subr.mxu0 %v3779_v44  ;;  %3648 = vmatprep.subr.mxu1 %v3780_v11  ;;  %v2092_v20 = vadd.f32 %v5076_v45, %v2052_v29  ;;  %v3788_v29 = vld [vmem:[%s5757_s1 + $0x90] sm:$0xff]  ;;  %v3791_v44 = vld [vmem:[%s5757_s1 + $0x88] sm:$0xff] }
 0x3a5   : > { %v1785_v30 = vpop.permute.xlu0 %1784  ;;  %3649 = vmatpush3.msra.mxu1 %v3781_v50  ;;  %3605 = vmatpush3.msra.mxu0 %v3782_v51  ;;  %v1794_v35 = vsel %vm1786_vm3, %v1769_v16, %v1777_v48  ;;  %v5459_v52 = vsel %vm2106_vm0, %v2090_v36, %v2123_v8  ;;  %v1856_v36 = vsel %vm5094_vm6, %v1840_v23, 0.0  ;;  %v3787_v16 = vld [vmem:[%s5757_s1 + $0x190] sm:$0xff]  ;;  %v1915_v62 = vmul.f32 %v5069_v15, %v5004_v55  ;;  %v3792_v11 = vld [vmem:[%s5757_s1 + $0x188] sm:$0xff] }
 0x3a6   : > { %v1790_v25 = vsel %vm1786_vm3, %v1777_v48, %v1785_v30  ;;  %v1802_v21 = vsel %vm1786_vm3, %v1785_v30, %v1761_v53  ;;  %v5451_v45 = vsel %vm2107_vm15, %v2091_v43, %v2124_v33  ;;  %3606 = vmatprep.subr.mxu0 %v3783_v6  ;;  %vm2109_vm12 = vcmp.gt.f32.partialorder %v2093_v37, 0.0  ;;  %v3784_v53 = vld [vmem:[%s5757_s1 + $0x198] sm:$0xff]  ;;  %v3789_v43 = vld [vmem:[%s5757_s1 + $0x110] sm:$0xff]  ;;  %v3793_v30 = vld [vmem:[%s5757_s1 + $0x8] sm:$0xff] }
 0x3a7   : > { %v1839_v59 = vmul.f32 %v5067_v17, %v1802_v21  ;;  %v1944_v57 = vpop.permute.xlu1 %1943  ;;  %2229 = vmatprep.mubr.f32.mxu0 %v5451_v45  ;;  %3650 = vmatprep.subr.mxu1 %v3784_v53  ;;  %v2126_v0 = vmul.f32 %v5147_v63, %v2093_v37  ;;  %vm2108_vm3 = vcmp.gt.f32.partialorder %v2092_v20, 0.0  ;;  %v2125_v60 = vmul.f32 %v5147_v63, %v2092_v20 }
 0x3a8   : > { %2230 = vmatmul.mubr.f32.gmra.mxu0 %v5459_v52  ;;  %3651 = vmatpush3.msra.mxu1 %v3785_v3  ;;  %v1841_v40 = vmul.f32 %v5067_v17, %v1794_v35  ;;  %v1842_v39 = vmul.f32 %v5067_v17, %v1790_v25  ;;  %v1912_v17 = vmul.f32 %v5069_v15, %v4992_v14  ;;  %v3790_v15 = vld [vmem:[%s5757_s1 + $0x10] sm:$0xff]  ;;  %v3796_v25 = vld [vmem:[%s5757_s1 + $0x180] sm:$0xff] }
 0x3a9   : > { %v1855_v54 = vsel %vm1803_vm4, %v1839_v59, 0.0  ;;  %v1952_v12 = vpop.permute.xlu0 %1951  ;;  %3607 = vmatpush3.msra.mxu0 %v3786_v9  ;;  %3652 = vmatprep.subr.mxu1 %v3787_v16  ;;  %v5489_v34 = vsel %vm2109_vm12, %v2093_v37, %v2126_v0  ;;  %v5501_v14 = vsel %vm2108_vm3, %v2092_v20, %v2125_v60  ;;  %v1929_v31 = vadd.f32 %v1913_v28, %v1856_v36  ;;  %v3794_v20 = vld [vmem:[%s5757_s1 + $0x108] sm:$0xff]  ;;  %v5996_v0 = vld [vmem:[#allocation57_spill] sm:$0xff] }
 0x3aa   : > { %v1981_v1 = vsel %vm1969_vm5, %v1944_v57, %v1952_v12  ;;  %3608 = vmatprep.subr.mxu0 %v3788_v29  ;;  %2314 = vmatprep.mubr.f32.mxu1 %v5489_v34  ;;  %v1928_v48 = vadd.f32 %v1912_v17, %v1855_v54  ;;  %v1857_v8 = vsel %vm5102_vm7, %v1841_v40, 0.0  ;;  %v1858_v27 = vsel %vm5106_vm8, %v1842_v39, 0.0  ;;  %v5995_v28 = vld [vmem:[#allocation16_spill] sm:$0xff] }
 0x3ab   : > { %v2022_v24 = vmul.f32 %v5071_v22, %v1981_v1  ;;  %v1960_v13 = vpop.permute.xlu1 %1959  ;;  %3653 = vmatpush3.msra.mxu1 %v3789_v43  ;;  %3609 = vmatpush3.msra.mxu0 %v3790_v15  ;;  %v1930_v21 = vadd.f32 %v1914_v56, %v1857_v8  ;;  %v1931_v6 = vadd.f32 %v1915_v62, %v1858_v27  ;;  %v5594_v15 = vld [vmem:[%s5758_s2] sm:$0xff]  ;;  %v5601_v8 = vld [vmem:[%s5758_s2 + $0x8] sm:$0xff] }
 0x3ac   : > { %2315 = vmatmul.mubr.f32.gmra.mxu1 %v5501_v14  ;;  %v1977_v55 = vsel %vm1969_vm5, %v1952_v12, %v1960_v13  ;;  %3610 = vmatprep.subr.mxu0 %v3791_v44  ;;  %v2339_v1 = vmul.f32 %v5168_v41, %v5168_v41  ;;  %v2343_v43 = vmul.f32 %v5304_v38, %v5304_v38 }
 0x3ad   : > { %v2038_v61 = vsel %vm1969_vm5, %v2022_v24, 0.0  ;;  %v2023_v33 = vmul.f32 %v5071_v22, %v1977_v55  ;;  %v1968_v37 = vpop.permute.xlu0 %1967  ;;  %3654 = vmatprep.subr.mxu1 %v3792_v11  ;;  %3611 = vmatpush3.msra.mxu0 %v3793_v30  ;;  %v2341_v24 = vmul.f32 %v5190_v5, %v5190_v5  ;;  %v2344_v55 = vmul.f32 %v5353_v7, %v5353_v7 }
 0x3ae   : > { %v2054_v2 = vadd.f32 %v2038_v61, %v1928_v48  ;;  %v1973_v4 = vsel %vm1969_vm5, %v1960_v13, %v1968_v37  ;;  %v1985_v23 = vsel %vm1969_vm5, %v1968_v37, %v1944_v57  ;;  %3655 = vmatpush3.msra.mxu1 %v3794_v20  ;;  %3612 = vmatprep.subr.mxu0 %v3795_v42 }
 0x3af   : > { %v2039_v50 = vsel %vm5117_vm9, %v2023_v33, 0.0  ;;  %v2024_v51 = vmul.f32 %v5071_v22, %v1973_v4  ;;  %v2025_v35 = vmul.f32 %v5071_v22, %v1985_v23  ;;  %3656 = vmatprep.subr.mxu1 %v3796_v25  ;;  %v3798_v22 = vld [vmem:[%s5757_s1] sm:$0xff]  ;;  %v2340_v13 = vmul.f32 %v5202_v10, %v5202_v10 }
 0x3b0   : > { %v2055_v59 = vadd.f32 %v2039_v50, %v1929_v31  ;;  %3657 = vmatpush3.msra.mxu1 %v3797_v19  ;;  %3613 = vmatpush3.msra.mxu0 %v3798_v22  ;;  %v2345_v31 = vmul.f32 %v5341_v58, %v5341_v58  ;;  %v2342_v48 = vmul.f32 %v5314_v46, %v5314_v46 }
 0x3b1   : > { %v2040_v57 = vsel %vm5123_vm10, %v2024_v51, 0.0  ;;  %v2041_v53 = vsel %vm5127_vm11, %v2025_v35, 0.0  ;;  %3295 = vmatprep.subr.msk.mxu0 %vm1265_vm1, %v5995_v28  ;;  %3298 = vmatprep.subr.msk.mxu1 %vm1265_vm1, %v5996_v0  ;;  %v2347_v27 = vmul.f32 %v5451_v45, %v5451_v45  ;;  %v2349_v61 = vmul.f32 %v5489_v34, %v5489_v34 }
 0x3b2   : > { %v2056_v60 = vadd.f32 %v2040_v57, %v1930_v21  ;;  %v2057_v3 = vadd.f32 %v2041_v53, %v1931_v6  ;;  %v2346_v33 = vmul.f32 %v5459_v52, %v5459_v52  ;;  %v2348_v37 = vmul.f32 %v5501_v14, %v5501_v14 }
 0x3b8   : > { %v2080_v36 = vpop.permute.xlu1 %2079 }
 0x3b9   : > { %v2094_v40 = vadd.f32 %v2080_v36, %v2054_v2  ;;  %v2095_v39 = vadd.f32 %v2080_v36, %v2055_v59  ;;  %v2096_v54 = vadd.f32 %v2080_v36, %v2056_v60  ;;  %v2097_v12 = vadd.f32 %v2080_v36, %v2057_v3 }
 0x3bb   : > { %vm2113_vm4 = vcmp.gt.f32.partialorder %v2097_v12, 0.0  ;;  %v2130_v32 = vmul.f32 %v5147_v63, %v2097_v12  ;;  %vm2111_vm5 = vcmp.gt.f32.partialorder %v2095_v39, 0.0  ;;  %v2128_v26 = vmul.f32 %v5147_v63, %v2095_v39 }
 0x3bc   : > { %vm2110_vm6 = vcmp.gt.f32.partialorder %v2094_v40, 0.0  ;;  %v2127_v9 = vmul.f32 %v5147_v63, %v2094_v40  ;;  %vm2112_vm7 = vcmp.gt.f32.partialorder %v2096_v54, 0.0  ;;  %v2129_v16 = vmul.f32 %v5147_v63, %v2096_v54 }
 0x3bd   : > { %v5563_v56 = vsel %vm2113_vm4, %v2097_v12, %v2130_v32  ;;  %v5565_v17 = vsel %vm2111_vm5, %v2095_v39, %v2128_v26  ;;  %v2338_v63 = vmul.f32 %v5172_v49, %v5172_v49 }
 0x3be   : > { %2319 = vmatprep.mubr.f32.mxu1 %v5563_v56  ;;  %2234 = vmatprep.mubr.f32.mxu0 %v5565_v17  ;;  %v5571_v29 = vsel %vm2110_vm6, %v2094_v40, %v2127_v9  ;;  %v5573_v62 = vsel %vm2112_vm7, %v2096_v54, %v2129_v16  ;;  %v2351_v44 = vmul.f32 %v5565_v17, %v5565_v17 }
 0x3bf   : > { %2235 = vmatmul.mubr.f32.gmra.mxu0 %v5571_v29  ;;  %2320 = vmatmul.mubr.f32.gmra.mxu1 %v5573_v62  ;;  %v2353_v11 = vmul.f32 %v5563_v56, %v5563_v56  ;;  %v2350_v2 = vmul.f32 %v5571_v29, %v5571_v29  ;;  %v2352_v4 = vmul.f32 %v5573_v62, %v5573_v62 }
 0x3c0   : > { %2418 = vmatprep.mubr.f32.mxu0 %v2339_v1  ;;  %2503 = vmatprep.mubr.f32.mxu1 %v2341_v24 }
 0x3c3   : > { %2419 = vmatmul.mubr.f32.vlgmr.msra.gmra.mxu0 %v2338_v63  ;;  %2504 = vmatmul.mubr.f32.vlgmr.msra.gmra.mxu1 %v2340_v13 }
 0x3c4   : > { %2423 = vmatprep.mubr.f32.mxu0 %v2343_v43  ;;  %2508 = vmatprep.mubr.f32.mxu1 %v2345_v31 }
 0x3c5   : > { %3296 = vmatpush1.msk.msra.mxu0 %vm1265_vm1, %v5594_v15  ;;  %3299 = vmatpush1.msk.msra.mxu1 %vm1265_vm1, %v5601_v8 }
 0x3c6   : > { %3301 = vmatprep.subr.msk.mxu0 %vm1265_vm1, %v5995_v28  ;;  %3304 = vmatprep.subr.msk.mxu1 %vm1265_vm1, %v5996_v0 }
 0x3c7   : > { %2424 = vmatmul.mubr.f32.gmra.mxu0 %v2342_v48  ;;  %2509 = vmatmul.mubr.f32.gmra.mxu1 %v2344_v55 }
 0x3c8   : > { %2428 = vmatprep.mubr.f32.mxu0 %v2347_v27  ;;  %2513 = vmatprep.mubr.f32.mxu1 %v2349_v61 }
 0x3cb   : > { %2429 = vmatmul.mubr.f32.gmra.mxu0 %v2346_v33  ;;  %2514 = vmatmul.mubr.f32.gmra.mxu1 %v2348_v37 }
 0x3cc   : > { %2433 = vmatprep.mubr.f32.mxu0 %v2351_v44  ;;  %2518 = vmatprep.mubr.f32.mxu1 %v2353_v11 }
 0x3cf   : > { %2434 = vmatmul.mubr.f32.gmra.mxu0 %v2350_v2  ;;  %2519 = vmatmul.mubr.f32.gmra.mxu1 %v2352_v4 }
 0x3d0   : > { %2611 = vmatprep.mubr.f32.mxu0 %v5935_v47  ;;  %2682 = vmatprep.mubr.f32.mxu1 %v5935_v47 }
 0x448   : > { %v3526_v30 = vpop.f32.mrf.mxu0 }
 0x44a   : > { %v3527_v50 = vpop.f32.mrf.mxu0 }
 0x44b   : > { %v3570_v23 = vpop.f32.mrf.mxu1  ;;  %v3528_v0 = vadd.f32 %v3527_v50, %v3526_v30 }
 0x44d   : > { %v3571_v20 = vpop.f32.mrf.mxu1 }
 0x44e   : > { %v3572_v57 = vadd.f32 %v3571_v20, %v3570_v23 }
 0x450   : > { %v2307_v36 = vadd.f32 %v3572_v57, %v3528_v0 }
 0x452   : > { %v2325_v9 = vsel %vm1038_vm2, %v2307_v36, 0.0 }
 0x458   : > { %v3529_v35 = vpop.f32.mrf.mxu0 }
 0x45a   : > { %v3530_v25 = vpop.f32.mrf.mxu0 }
 0x45b   : > { %v3573_v51 = vpop.f32.mrf.mxu1  ;;  %v3531_v53 = vadd.f32 %v3530_v25, %v3529_v35 }
 0x45d   : > { %v3574_v42 = vpop.f32.mrf.mxu1 }
 0x45e   : > { %v3575_v19 = vadd.f32 %v3574_v42, %v3573_v51 }
 0x460   : > { %v2312_v60 = vadd.f32 %v3575_v19, %v3531_v53 }
 0x462   : > { %v2326_v12 = vsel %vm1038_vm2, %v2312_v60, 0.0 }
 0x463   : > { %v2327_v63 = vadd.f32 %v2326_v12, %v2325_v9 }
 0x468   : > { %v3532_v6 = vpop.f32.mrf.mxu0 }
 0x46a   : > { %v3533_v22 = vpop.f32.mrf.mxu0 }
 0x46b   : > { %v3534_v3 = vadd.f32 %v3533_v22, %v3532_v6 }
 0x46c   : > { %v3576_v21 = vpop.f32.mrf.mxu1 }
 0x46e   : > { %v3577_v59 = vpop.f32.mrf.mxu1 }
 0x46f   : > { %v3578_v28 = vadd.f32 %v3577_v59, %v3576_v21 }
 0x471   : > { %v2317_v40 = vadd.f32 %v3578_v28, %v3534_v3 }
 0x473   : > { %v2328_v16 = vsel %vm1038_vm2, %v2317_v40, 0.0 }
 0x474   : > { %v2329_v48 = vadd.f32 %v2328_v16, %v2327_v63 }
 0x47f   : > { %v3535_v39 = vpop.f32.mrf.mxu0  ;;  %v3579_v54 = vpop.f32.mrf.mxu1 }
 0x481   : > { %v3536_v32 = vpop.f32.mrf.mxu0  ;;  %v3580_v26 = vpop.f32.mrf.mxu1 }
 0x482   : > { %v3537_v1 = vadd.f32 %v3536_v32, %v3535_v39  ;;  %v3581_v24 = vadd.f32 %v3580_v26, %v3579_v54 }
 0x483   : > { %v3614_v13 = vpop.f32.mrf.mxu0  ;;  %v3658_v43 = vpop.f32.mrf.mxu1 }
 0x484   : > { %v2322_v31 = vadd.f32 %v3581_v24, %v3537_v1 }
 0x485   : > { %v3615_v55 = vpop.f32.mrf.mxu0  ;;  %v3659_v27 = vpop.f32.mrf.mxu1 }
 0x486   : > { %v2330_v61 = vsel %vm1038_vm2, %v2322_v31, 0.0  ;;  %v3616_v23 = vadd.f32 %v3615_v55, %v3614_v13  ;;  %v3660_v30 = vadd.f32 %v3659_v27, %v3658_v43 }
 0x487   : > { %v2331_v33 = vadd.f32 %v2330_v61, %v2329_v48  ;;  %v3617_v37 = vpop.f32.mrf.mxu0  ;;  %v3661_v44 = vpop.f32.mrf.mxu1 }
 0x488   : > { %v2506_v19 = vadd.f32 %v3660_v30, %v3616_v23  ;;  %v2916_v30 = vpop.permute.xlu0 %2915 }
 0x489   : > { %v2332_v11 = vrot.slane %v2331_v33, 4  ;;  %v3618_v2 = vpop.f32.mrf.mxu0  ;;  %v3662_v4 = vpop.f32.mrf.mxu1 }
 0x48a   : > { %v3619_v20 = vadd.f32 %v3618_v2, %v3617_v37  ;;  %v3663_v50 = vadd.f32 %v3662_v4, %v3661_v44  ;;  %v2524_v54 = vsel %vm1038_vm2, %v2506_v19, 0.0 }
 0x48b   : > { %v2333_v51 = vadd.f32 %v2332_v11, %v2331_v33  ;;  %v3620_v35 = vpop.f32.mrf.mxu0  ;;  %v3664_v42 = vpop.f32.mrf.mxu1 }
 0x48c   : > { %v2511_v25 = vadd.f32 %v3663_v50, %v3619_v20 }
 0x48d   : > { %v2334_v21 = vrot.slane %v2333_v51, 2  ;;  %v3621_v6 = vpop.f32.mrf.mxu0  ;;  %v3665_v59 = vpop.f32.mrf.mxu1 }
 0x48e   : > { %v3622_v22 = vadd.f32 %v3621_v6, %v3620_v35  ;;  %v3666_v57 = vadd.f32 %v3665_v59, %v3664_v42  ;;  %v2525_v60 = vsel %vm1038_vm2, %v2511_v25, 0.0  ;;  %v2911_v42 = vpop.permute.xlu1 %2910 }
 0x48f   : > { %v2335_v53 = vadd.f32 %v2334_v21, %v2333_v51  ;;  %v3623_v28 = vpop.f32.mrf.mxu0  ;;  %v3667_v0 = vpop.f32.mrf.mxu1  ;;  %v2526_v16 = vadd.f32 %v2525_v60, %v2524_v54 }
 0x490   : > { %v2516_v3 = vadd.f32 %v3666_v57, %v3622_v22  ;;  %v2952_v60 = vpop.permute.xlu0 %2951 }
 0x491   : > { %v2336_v36 = vrot.slane %v2335_v53, 1  ;;  %v3624_v40 = vpop.f32.mrf.mxu0  ;;  %v3668_v39 = vpop.f32.mrf.mxu1 }
 0x492   : > { %v2527_v12 = vsel %vm1038_vm2, %v2516_v3, 0.0  ;;  %v3625_v32 = vadd.f32 %v3624_v40, %v3623_v28  ;;  %v3669_v26 = vadd.f32 %v3668_v39, %v3667_v0 }
 0x493   : > { %v2337_v9 = vadd.f32 %v2336_v36, %v2335_v53  ;;  %v2528_v63 = vadd.f32 %v2527_v12, %v2526_v16 }
 0x494   : > { %v2521_v1 = vadd.f32 %v3669_v26, %v3625_v32  ;;  %v2906_v32 = vpop.permute.xlu1 %2905 }
 0x495   : > { %v2537_v24 = vmul.f32 0.00024414063, %v2337_v9 }
 0x496   : > { %v2529_v13 = vsel %vm1038_vm2, %v2521_v1, 0.0 }
 0x497   : > { %v2530_v43 = vadd.f32 %v2529_v13, %v2528_v63  ;;  %3297 = vmatmul.mubr.msk.f32.vlgmr.msra.gmra.mxu0 %vm1038_vm2, %v2537_v24  ;;  %3300 = vmatmul.mubr.msk.f32.vlgmr.msra.gmra.mxu1 %vm1038_vm2, %v2537_v24  ;;  %v2539_v44 = vmul.f32 %v2537_v24, %v2537_v24 }
 0x498   : > { %3302 = vmatpush1.msk.msra.mxu0 %vm1265_vm1, %v5594_v15  ;;  %3305 = vmatpush1.msk.msra.mxu1 %vm1265_vm1, %v5601_v8  ;;  %vm2984_vm1 = vcmask 261120  }
 0x499   : > { %v2531_v31 = vrot.slane %v2530_v43, 4  ;;  %2756 = vmatprep.mubr.f32.mxu0 %v5935_v47  ;;  %2827 = vmatprep.mubr.f32.mxu1 %v5935_v47 }
 0x49b   : > { %v2532_v48 = vadd.f32 %v2531_v31, %v2530_v43 }
 0x49d   : > { %v2533_v55 = vrot.slane %v2532_v48, 2 }
 0x49f   : > { %v2534_v27 = vadd.f32 %v2533_v55, %v2532_v48  ;;  %v2947_v55 = vpop.permute.xlu0 %2946 }
 0x4a1   : > { %v2535_v61 = vrot.slane %v2534_v27, 1 }
 0x4a3   : > { %v2536_v33 = vadd.f32 %v2535_v61, %v2534_v27 }
 0x4a5   : > { %v2538_v37 = vmul.f32 0.00024414063, %v2536_v33 }
 0x4a7   : > { %v2540_v11 = vsub.f32 %v2538_v37, %v2539_v44 }
 0x4a9   : > { %v2541_v2 = vmax.f32 %v2540_v11, 0.0 }
 0x4ab   : > { %v2542_v4 = vadd.f32 1e-05, %v2541_v2  ;;  %v2901_v2 = vpop.permute.xlu1 %2900 }
 0x4ad   : > { %3733 = vrsqrt.f32 %v2542_v4 }
 0x4ba   : > { %v3734_v15 = vpop.eup %3733 }
 0x4bb   : > { %3303 = vmatmul.mubr.msk.f32.vlgmr.msra.gmra.mxu0 %vm1038_vm2, %v3734_v15  ;;  %3306 = vmatmul.mubr.msk.f32.vlgmr.msra.gmra.mxu1 %vm1038_vm2, %v3734_v15 }
 0x4bc   : > { %3055 = vmatprep.mubr.f32.mxu0 %v5935_v47  ;;  %3132 = vmatprep.mubr.f32.mxu1 %v5935_v47 }
 0x557   : > { %v2613_v8 = vpop.f32.mrf.mxu0  ;;  %v2684_v23 = vpop.f32.mrf.mxu1 }
 0x558   : > { %v2837_v20 = vrot.slane %v2613_v8, %v4846_v18  ;;  %v2845_v51 = vrot.slane %v2684_v23, %v4846_v18 }
 0x559   : > { %v2615_v50 = vpop.f32.mrf.mxu0  ;;  %v2686_v35 = vpop.f32.mrf.mxu1 }
 0x55a   : > { %v5650_v25 = vrot.slane %v2615_v50, %v4846_v18  ;;  %v2850_v21 = vsub.f32 %v5172_v49, %v2837_v20  ;;  %v2854_v6 = vsub.f32 %v5314_v46, %v2837_v20  ;;  %v2849_v59 = vrot.slane %v2686_v35, %v4846_v18 }
 0x55b   : > { %v2858_v19 = vsub.f32 %v5459_v52, %v2837_v20  ;;  %v2862_v22 = vsub.f32 %v5571_v29, %v2837_v20  ;;  %v2852_v57 = vsub.f32 %v5202_v10, %v2845_v51  ;;  %v2856_v53 = vsub.f32 %v5353_v7, %v2845_v51 }
 0x55c   : > { %v2860_v3 = vsub.f32 %v5501_v14, %v2845_v51  ;;  %v2864_v36 = vsub.f32 %v5573_v62, %v2845_v51  ;;  %v2851_v52 = vsub.f32 %v5168_v41, %v5650_v25  ;;  %v2855_v29 = vsub.f32 %v5304_v38, %v5650_v25 }
 0x55d   : > { %v2859_v10 = vsub.f32 %v5451_v45, %v5650_v25  ;;  %v2863_v7 = vsub.f32 %v5565_v17, %v5650_v25  ;;  %v2853_v62 = vsub.f32 %v5190_v5, %v2849_v59  ;;  %v2857_v39 = vsub.f32 %v5341_v58, %v2849_v59 }
 0x55e   : > { %v2861_v38 = vsub.f32 %v5489_v34, %v2849_v59  ;;  %v2865_v45 = vsub.f32 %v5563_v56, %v2849_v59 }
 0x57b   : > { %v2758_v28 = vpop.f32.mrf.mxu0  ;;  %v2829_v0 = vpop.f32.mrf.mxu1 }
 0x57c   : > { %v2869_v49 = vrot.slane %v2758_v28, %v4846_v18  ;;  %v2877_v46 = vrot.slane %v2829_v0, %v4846_v18 }
 0x57d   : > { %v2760_v40 = vpop.f32.mrf.mxu0  ;;  %v2831_v14 = vpop.f32.mrf.mxu1 }
 0x57e   : > { %v2890_v54 = vmul.f32 %v2869_v49, %v2858_v19  ;;  %v2894_v12 = vmul.f32 %v2869_v49, %v2862_v22  ;;  %v2886_v26 = vmul.f32 %v2869_v49, %v2854_v6  ;;  %v2888_v41 = vmul.f32 %v2877_v46, %v2856_v53  ;;  %v2942_v22 = vpop.permute.xlu0 %2941 }
 0x57f   : > { %v2892_v9 = vmul.f32 %v2877_v46, %v2860_v3  ;;  %v2896_v16 = vmul.f32 %v2877_v46, %v2864_v36  ;;  %v2873_v1 = vrot.slane %v2760_v40, %v4846_v18  ;;  %v2881_v17 = vrot.slane %v2831_v14, %v4846_v18 }
 0x580   : > { %v2882_v24 = vmul.f32 %v2869_v49, %v2850_v21  ;;  %v2884_v63 = vmul.f32 %v2877_v46, %v2852_v57  ;;  %v2930_v5 = vmul.f32 %v2916_v30, %v2894_v12  ;;  %v2926_v48 = vmul.f32 %v2911_v42, %v2890_v54 }
 0x581   : > { %v2932_v13 = vmul.f32 %v2916_v30, %v2896_v16  ;;  %v2895_v58 = vmul.f32 %v2873_v1, %v2863_v7  ;;  %v2897_v43 = vmul.f32 %v2881_v17, %v2865_v45  ;;  %v2891_v31 = vmul.f32 %v2873_v1, %v2859_v10  ;;  %v2970_v10 = vld [vmem:[%s5767_s11] sm:$0xff]  ;;  %v2971_v7 = vld [vmem:[%s5767_s11 + $0x8] sm:$0xff] }
 0x582   : > { %v2893_v27 = vmul.f32 %v2881_v17, %v2861_v38  ;;  %v2928_v61 = vmul.f32 %v2911_v42, %v2892_v9  ;;  %v2922_v33 = vmul.f32 %v2906_v32, %v2886_v26  ;;  %v2924_v37 = vmul.f32 %v2906_v32, %v2888_v41  ;;  %v2977_v40 = vpop.permute.xlu0 %2976  ;;  %v3801_v41 = vld [vmem:[%s4057_s23] sm:$0xff] }
 0x583   : > { %v2931_v34 = vmul.f32 %v2916_v30, %v2895_v58  ;;  %v2933_v44 = vmul.f32 %v2916_v30, %v2897_v43  ;;  %v2927_v56 = vmul.f32 %v2911_v42, %v2891_v31  ;;  %v2887_v11 = vmul.f32 %v2873_v1, %v2855_v29 }
 0x584   : > { %v2966_v4 = vadd.f32 %v2952_v60, %v2930_v5  ;;  %v2968_v18 = vadd.f32 %v2952_v60, %v2932_v13  ;;  %v2929_v15 = vmul.f32 %v2911_v42, %v2893_v27  ;;  %v2889_v8 = vmul.f32 %v2881_v17, %v2857_v39  ;;  %v3804_v5 = vld [vmem:[%s4057_s23 + $0x18] sm:$0xff] }
 0x585   : > { %v2967_v23 = vadd.f32 %v2952_v60, %v2931_v34  ;;  %v2969_v20 = vadd.f32 %v2952_v60, %v2933_v44  ;;  %v2962_v50 = vadd.f32 %v2947_v55, %v2926_v48  ;;  %v2923_v51 = vmul.f32 %v2906_v32, %v2887_v11  ;;  %v2937_v60 = vpop.permute.xlu1 %2936  ;;  %v3807_v44 = vld [vmem:[%s4057_s23 + $0x28] sm:$0xff]  ;;  %v3808_v11 = vld [vmem:[%s4057_s23 + $0x38] sm:$0xff] }
 0x586   : > { %v2964_v35 = vadd.f32 %v2947_v55, %v2928_v61  ;;  %v2925_v25 = vmul.f32 %v2906_v32, %v2889_v8  ;;  %v2883_v21 = vmul.f32 %v2873_v1, %v2851_v52  ;;  %v2885_v6 = vmul.f32 %v2881_v17, %v2853_v62  ;;  %v3806_v61 = vld [vmem:[%s4057_s23 + $0x30] sm:$0xff] }
 0x587   : > { %3015 = vmatprep.subr.mxu0 %v2967_v23  ;;  %3092 = vmatprep.subr.mxu1 %v2969_v20  ;;  %v2963_v59 = vadd.f32 %v2947_v55, %v2927_v56  ;;  %v2965_v19 = vadd.f32 %v2947_v55, %v2929_v15  ;;  %v2918_v30 = vmul.f32 %v2901_v2, %v2882_v24  ;;  %v3803_v24 = vld [vmem:[%s4057_s23 + $0x8] sm:$0xff]  ;;  %v3805_v55 = vld [vmem:[%s4057_s23 + $0x20] sm:$0xff] }
 0x588   : > { %3016 = vmatpush1.msra.mxu0 %v2966_v4  ;;  %3093 = vmatpush1.msra.mxu1 %v2968_v18  ;;  %v2919_v57 = vmul.f32 %v2901_v2, %v2883_v21  ;;  %v2921_v53 = vmul.f32 %v2901_v2, %v2885_v6  ;;  %v2920_v42 = vmul.f32 %v2901_v2, %v2884_v63 }
 0x589   : > { %3017 = vmatprep.subr.mxu0 %v2963_v59  ;;  %3094 = vmatprep.subr.mxu1 %v2965_v19  ;;  %v2959_v28 = vadd.f32 %v2942_v22, %v2923_v51  ;;  %v2961_v0 = vadd.f32 %v2942_v22, %v2925_v25  ;;  %v2958_v3 = vadd.f32 %v2942_v22, %v2922_v33  ;;  %v2982_v26 = vpop.permute.xlu1 %2981 }
 0x58a   : > { %3018 = vmatpush1.msra.mxu0 %v2962_v50  ;;  %3095 = vmatpush1.msra.mxu1 %v2964_v35  ;;  %v2960_v36 = vadd.f32 %v2942_v22, %v2924_v37  ;;  %v2955_v49 = vadd.f32 %v2937_v60, %v2919_v57  ;;  %v2957_v46 = vadd.f32 %v2937_v60, %v2921_v53 }
 0x58b   : > { %3019 = vmatprep.subr.mxu0 %v2959_v28  ;;  %3096 = vmatprep.subr.mxu1 %v2961_v0  ;;  %v2954_v52 = vadd.f32 %v2937_v60, %v2918_v30  ;;  %v2956_v29 = vadd.f32 %v2937_v60, %v2920_v42 }
 0x58c   : > { %3020 = vmatpush1.msra.mxu0 %v2958_v3  ;;  %3097 = vmatpush1.msra.mxu1 %v2960_v36 }
 0x58d   : > { %3021 = vmatprep.subr.mxu0 %v2955_v49  ;;  %3098 = vmatprep.subr.mxu1 %v2957_v46 }
 0x58e   : > { %3022 = vmatpush1.msra.mxu0 %v2954_v52  ;;  %3099 = vmatpush1.msra.mxu1 %v2956_v29 }
 0x58f   : > { %3307 = vmatmul.mubr.msk.f32.vlgmr.msra.gmra.mxu0 %vm2984_vm1, %v2970_v10  ;;  %3309 = vmatmul.mubr.msk.f32.vlgmr.msra.gmra.mxu1 %vm2984_vm1, %v2970_v10 }
 0x590   : > { %3061 = vmatprep.mubr.f32.mxu0 %v5935_v47  ;;  %3138 = vmatprep.mubr.f32.mxu1 %v5935_v47  ;;  %v3802_v47 = vld [vmem:[%s4057_s23 + $0x10] sm:$0xff] }
 0x593   : > { %3308 = vmatmul.mubr.msk.f32.gmra.mxu0 %vm2984_vm1, %v2971_v7  ;;  %3310 = vmatmul.mubr.msk.f32.gmra.mxu1 %vm2984_vm1, %v2971_v7 }
 0x64f   : > { %v3057_v14 = vpop.f32.mrf.mxu0  ;;  %v3134_v62 = vpop.f32.mrf.mxu1 }
 0x650   : > { %v3058_v39 = vadd.f32 %v3057_v14, %v2977_v40  ;;  %v3135_v54 = vadd.f32 %v3134_v62, %v2977_v40 }
 0x651   : > { %v3059_v12 = vpop.f32.mrf.mxu0  ;;  %v3136_v32 = vpop.f32.mrf.mxu1 }
 0x652   : > { %v3145_v9 = vadd.f32 %v3801_v41, %v3058_v39  ;;  %v3147_v16 = vadd.f32 %v3802_v47, %v3135_v54  ;;  %v3060_v38 = vadd.f32 %v3059_v12, %v2977_v40  ;;  %v3137_v45 = vadd.f32 %v3136_v32, %v2977_v40 }
 0x653   : > { %v3063_v1 = vpop.f32.mrf.mxu0  ;;  %v3140_v17 = vpop.f32.mrf.mxu1 }
 0x654   : > { %3153 = vst [vmem:[%s5688_s28] sm:$0xff] %v3145_v9  ;;  %3155 = vst [vmem:[%s5688_s28 + $0x10] sm:$0xff] %v3147_v16  ;;  %v3146_v63 = vadd.f32 %v3803_v24, %v3060_v38  ;;  %v3148_v13 = vadd.f32 %v3804_v5, %v3137_v45  ;;  %v3064_v58 = vadd.f32 %v3063_v1, %v2982_v26 }
 0x655   : > { %v3141_v43 = vadd.f32 %v3140_v17, %v2982_v26  ;;  %v3065_v31 = vpop.f32.mrf.mxu0  ;;  %v3142_v48 = vpop.f32.mrf.mxu1 }
 0x656   : > { %3154 = vst [vmem:[%s5688_s28 + $0x8] sm:$0xff] %v3146_v63  ;;  %3156 = vst [vmem:[%s5688_s28 + $0x18] sm:$0xff] %v3148_v13  ;;  %v3149_v27 = vadd.f32 %v3805_v55, %v3064_v58  ;;  %v3066_v37 = vadd.f32 %v3065_v31, %v2982_v26  ;;  %v3143_v34 = vadd.f32 %v3142_v48, %v2982_v26 }
 0x657   : > { %v3151_v33 = vadd.f32 %v3806_v61, %v3141_v43 }
 0x658   : > { %3157 = vst [vmem:[%s5688_s28 + $0x20] sm:$0xff] %v3149_v27  ;;  %v3150_v56 = vadd.f32 %v3807_v44, %v3066_v37  ;;  %v3152_v2 = vadd.f32 %v3808_v11, %v3143_v34 }
 0x659   : > { %3159 = vst [vmem:[%s5688_s28 + $0x30] sm:$0xff] %v3151_v33 }
 0x65a   : > { %3158 = vst [vmem:[%s5688_s28 + $0x28] sm:$0xff] %v3150_v56  ;;  %3160 = vst [vmem:[%s5688_s28 + $0x38] sm:$0xff] %v3152_v2 }
 0x65b   : > { %3837 = shalt.err (!%p3834_p2)
}
 0x65c   : > { %s3838_s23 = scalar_lea.hbm %s5705_s3, 1024  ;;  %s3842_s17 = scalar_lea.hbm %s5770_s14, 2048 }
 0x65d   : > { %p3839_p3 = scmp.ne.s32.totalorder %s5705_s3, %s3838_s23  ;;  %p3843_p8 = scmp.lt.s32.totalorder %s5705_s3, %s5770_s14 }
 0x65e   : > { %p3844_p9 = scmp.lt.s32.totalorder %s3842_s17, %s3838_s23 }
 0x65f   : > { %p3840_p4 = pnand %p3839_p3, %p5998_p10 }
 0x660   : > { %p3845_p5 = por %p3844_p9, %p3843_p8 }
 0x661   : > { %p3841_p7 = pneg %p3840_p4 }
 0x663   : > { %p3846_p11 = pnand %p3845_p5, %p3841_p7 }
 0x665   : > { %3849 = shalt.err (!%p3846_p11)
}
 0x666   : > { %s3896_s26 = smov 512   ;;  %s3897_s21 = smov 1024  }
 0x667   : > { %s3898_s13 = smov 32  }
 0x668   : > { %3674 = dma.vmem_to_hbm [thread:$0]  (%p5998_p10), %s5696_s18, 1024, %s5705_s3, %s5715_s20, %s3896_s26, %s3897_s21, %s3898_s13  }
 0x669 PF: > { %s3190_s27 = sand.u32 1, %s3876_s29   ;;  %p5999_p12 = scmp.ne.s32.totalorder %s5859_s25, 0 }
 0x66a   : > { %s3191_s23 = scalar_lea.sflag [#allocation4], %s3190_s27 }
 0x66b   : > { %p3681_p13 = pnand %p3258_p6, %p5999_p12 }
 0x66d   : > { %p3682_p0 = pneg %p3681_p13 }
 0x66f   : > { %3871 = dma.done.wait (%p3682_p0), %s3191_s23, 1024  }
 0x670   : > { %3873 = vsyncadd (%p3682_p0), %s3191_s23, 4294966272  ;;  %s6000_s16 = sld [smem:[#allocation9_spill]]  ;;  %s6002_s29 = smov %s3880_s30 }
 0x671   : > { %s6001_s28 = sld [smem:[#allocation10_spill]]  ;;  %s6003_s30 = smov %s3884_s15 }
 0x676   : > { %p25_p1 = scmp.ge.s32.totalorder %s6000_s16, 4  }
 0x677   : > { %s6004_s15 = smov %s6001_s28 }
 0x678   :  { %27 = sbr.rel (!%p25_p1) target bundleno = 8 (0x8), region = 146 }
 0x67d   :  { %3196 = vsyncpa [#allocation4], 1 }
 0x67e   :  { %3198 = vsyncpa [#allocation4 + $0x1], 1 }
 0x67f   :  { %3199 = vsyncpa [#allocation5], 1 }
 0x680   :  { %3201 = vsyncpa [#allocation5 + $0x1], 1 }

</bundles_post_ra>
